<compile_context>
chip_gen: v7x
topology: tpu7x:2x2x1
jax: 0.10.0
libtpu: 0.0.40
codegen_flags: <defaults>
</compile_context>

<pallas_src>
import functools

import jax
import jax.numpy as jnp
from jax import lax
from jax.experimental import pallas as pl
from jax.experimental.pallas import tpu as pltpu


def _round_up(v, m):
    return (v + m - 1) // m * m


def _lstm_recurrent_kernel(xproj_ref, wh_ref, out_ref, h_scr, c_scr,
                           *, hidden, t_blk, seq_len, needs_mask):
    """Grid = (batch_block, time_block); time is the sequential recurrence.

    xproj_ref : (T_BLK, B_BLK, 4H)  precomputed x @ Wx + b for this block
    wh_ref    : (H, 4H)             fused recurrent weights (grid-invariant)
    out_ref   : (B_BLK, H)          final hidden state for this batch block
    h_scr/c_scr : (B_BLK, H) f32    VMEM-resident recurrent state
    """
    tb = pl.program_id(1)

    @pl.when(tb == 0)
    def _():
        h_scr[...] = jnp.zeros_like(h_scr)
        c_scr[...] = jnp.zeros_like(c_scr)

    wh = wh_ref[...]                      # stays in VMEM across the whole grid
    t_base = tb * t_blk

    def step(s, carry):
        h, c = carry
        # Single fused (B, H) x (H, 4H) MXU op per timestep; the x-side
        # projection + bias were hoisted out of the recurrence.
        pre = xproj_ref[s] + jnp.dot(h.astype(wh.dtype), wh,
                                     preferred_element_type=jnp.float32)
        # One long EUP stream for the three sigmoid gates (i, f, o).
        gates = jax.nn.sigmoid(pre[:, :3 * hidden])
        i_g = gates[:, 0 * hidden:1 * hidden]
        f_g = gates[:, 1 * hidden:2 * hidden]
        o_g = gates[:, 2 * hidden:3 * hidden]
        c_tilda = jnp.tanh(pre[:, 3 * hidden:])
        c_new = f_g * c + i_g * c_tilda
        h_new = o_g * jnp.tanh(c_new)
        if needs_mask:
            # Only when M is not a multiple of T_BLK: freeze state on padded
            # timesteps so the final state equals the state at t = M.
            valid = (t_base + s) < seq_len
            h_new = jnp.where(valid, h_new, h)
            c_new = jnp.where(valid, c_new, c)
        return h_new, c_new

    # Carry state through the unrolled block in registers; touch VMEM scratch
    # only at block boundaries.
    h, c = lax.fori_loop(0, t_blk, step, (h_scr[...], c_scr[...]), unroll=True)
    h_scr[...] = h
    c_scr[...] = c

    @pl.when(tb == pl.num_programs(1) - 1)
    def _():
        out_ref[...] = h.astype(out_ref.dtype)


def lstm_forward(x, wx_all, wh_all, b_all, *, t_blk=8, b_blk=8,
                 compute_dtype=jnp.float32):
    """x: (B, M, Cin) float32.
    Fused weights, gate order [i | f | o | c~]:
      wx_all: (Cin, 4H), wh_all: (H, 4H), b_all: (1, 4H).
    Returns the final hidden state (B, H) float32."""
    B, M, Cin = x.shape
    H4 = wx_all.shape[-1]
    H = H4 // 4

    # ---- alignment: batch padded to sublane multiple, time to block size ---
    b_blk = max(8, b_blk)
    t_blk = max(1, min(t_blk, M))
    B_pad = _round_up(B, b_blk)
    M_pad = _round_up(M, t_blk)
    if B_pad != B:
        x = jnp.pad(x, ((0, B_pad - B), (0, 0), (0, 0)))

    # ---- hoist the input projection out of the recurrence ------------------
    # One large parallel GEMM over all M timesteps, produced directly in
    # timestep-major (M, B, 4H) layout (no standalone transpose of x).
    x_proj = jnp.einsum('bmc,cg->mbg', x.astype(compute_dtype),
                        wx_all.astype(compute_dtype),
                        preferred_element_type=jnp.float32)
    x_proj = x_proj + b_all[None].astype(jnp.float32)      # fold bias in
    if M_pad != M:
        x_proj = jnp.pad(x_proj, ((0, M_pad - M), (0, 0), (0, 0)))

    kernel = functools.partial(
        _lstm_recurrent_kernel, hidden=H, t_blk=t_blk, seq_len=M,
        needs_mask=(M_pad != M))

    n_b = B_pad // b_blk
    n_t = M_pad // t_blk

    def build(weight_pipeline_mode):
        if weight_pipeline_mode is None:
            wh_spec = pl.BlockSpec((H, H4), lambda b, t: (0, 0))
        else:
            wh_spec = pl.BlockSpec((H, H4), lambda b, t: (0, 0),
                                   pipeline_mode=weight_pipeline_mode)
        return pl.pallas_call(
            kernel,
            out_shape=jax.ShapeDtypeStruct((B_pad, H), jnp.float32),
            grid_spec=pltpu.PrefetchScalarGridSpec(
                num_scalar_prefetch=0,
                grid=(n_b, n_t),
                in_specs=[
                    # per-(batch block, time block) slab of x @ Wx + b
                    pl.BlockSpec((t_blk, b_blk, H4), lambda b, t: (t, b, 0)),
                    # recurrent weights: constant index_map -> DMA'd once
                    wh_spec,
                ],
                out_specs=pl.BlockSpec((b_blk, H), lambda b, t: (b, 0)),
                scratch_shapes=[
                    pltpu.VMEM((b_blk, H), jnp.float32),   # hidden state
                    pltpu.VMEM((b_blk, H), jnp.float32),   # cell state
                ],
            ),
            compiler_params=pltpu.CompilerParams(
                # batch blocks are independent (v7x megacore split);
                # the time axis is a true recurrence.
                dimension_semantics=("parallel", "arbitrary"),
            ),
        )

    operands = (x_proj, wh_all.astype(compute_dtype))
    try:
        # Single-buffer the grid-invariant recurrent weights: their block
        # index never changes, but default pipelining still reserves a 2nd
        # buffer (2x weight VMEM; matters on v7x's 64 MiB VMEM at large H).
        out = jax.block_until_ready(build(pl.Buffered(1))(*operands))
    except Exception:
        # Fallback if this Pallas build rejects pipeline_mode / Buffered(1)
        # on the top-level pallas_call pipeline.
        out = build(None)(*operands)

    return out[:B]


def lstm_reference(x, wx_all, wh_all, b_all):
    """Pure-JAX reference matching the PyTorch forward (fused-gate layout)."""
    B, M, _ = x.shape
    H = wh_all.shape[0]
    h = jnp.zeros((B, H), jnp.float32)
    c = jnp.zeros((B, H), jnp.float32)
    for t in range(M):
        pre = x[:, t, :] @ wx_all + h @ wh_all + b_all
        i_g = jax.nn.sigmoid(pre[:, 0 * H:1 * H])
        f_g = jax.nn.sigmoid(pre[:, 1 * H:2 * H])
        o_g = jax.nn.sigmoid(pre[:, 2 * H:3 * H])
        c_tilda = jnp.tanh(pre[:, 3 * H:])
        c = f_g * c + i_g * c_tilda
        h = o_g * jnp.tanh(c)
    return h


def init_params(key, input_channels, num_hiddens):
    """nn.Linear-style U(-1/sqrt(fan_in), 1/sqrt(fan_in)) init; the x-bias and
    h-bias of each gate are summed into a single bias (mathematically
    equivalent).  Gate order along the fused output axis: [i | f | o | c~]
    (note: NOT PyTorch nn.LSTM's (i,f,g,o) chunk order — this module uses
    separate Linears, so any consistent order is fine)."""
    ks = jax.random.split(key, 16)
    bx = 1.0 / jnp.sqrt(input_channels)
    bh = 1.0 / jnp.sqrt(num_hiddens)
    wx = jnp.concatenate([
        jax.random.uniform(ks[g], (input_channels, num_hiddens),
                           jnp.float32, -bx, bx) for g in range(4)], axis=1)
    wh = jnp.concatenate([
        jax.random.uniform(ks[4 + g], (num_hiddens, num_hiddens),
                           jnp.float32, -bh, bh) for g in range(4)], axis=1)
    b = jnp.concatenate([
        jax.random.uniform(ks[8 + g], (1, num_hiddens), jnp.float32, -bx, bx)
        + jax.random.uniform(ks[12 + g], (1, num_hiddens), jnp.float32, -bh, bh)
        for g in range(4)], axis=1)
    return wx, wh, b


if __name__ == "__main__":
    # Module call: LSTM(input_channels=4, num_hiddens=32, M=8) on input
    # viewed as (batch=2, M=8, channels=4).
    B, M, C_in, H = 2, 8, 4, 32

    key = jax.random.PRNGKey(0)
    k_x, k_p = jax.random.split(key)
    x = jax.random.normal(k_x, (B, M, C_in), jnp.float32)
    wx, wh, b = init_params(k_p, C_in, H)

    out = jax.block_until_ready(lstm_forward(x, wx, wh, b))
    ref = jax.block_until_ready(lstm_reference(x, wx, wh, b))

    assert out.shape == (B, H), out.shape
    err = jnp.max(jnp.abs(out - ref))
    assert jnp.allclose(out, ref, atol=1e-5, rtol=1e-5), f"max err {err}"
    print("KERNEL_OK")
</pallas_src>

<mosaic_0001>
module attributes {stable_mosaic.version = 11 : i64} {
  func.func @_lstm_recurrent_kernel(%arg0: i32, %arg1: i32, %arg2: memref<8x8x128xf32, #tpu.memory_space<vmem>>, %arg3: memref<32x128xf32, #tpu.memory_space<vmem>>, %arg4: memref<8x32xf32, #tpu.memory_space<vmem>>, %arg5: memref<8x32xf32, #tpu.memory_space<vmem>>, %arg6: memref<8x32xf32, #tpu.memory_space<vmem>>) attributes {dimension_semantics = [#tpu.dimension_semantics<parallel>, #tpu.dimension_semantics<arbitrary>], iteration_bounds = array<i64: 1, 1>, scalar_prefetch = 0 : i64, scratch_operands = 2 : i64, tpu.core_type = #tpu.core_type<tc>, window_params = [{transform_indices = @transform_0, window_bounds = array<i64: 8, 8, 128>}, {pipeline_mode = #tpu.pipeline_mode<synchronous>, transform_indices = @transform_1, window_bounds = array<i64: 32, 128>}, {transform_indices = @transform_2, window_bounds = array<i64: 8, 32>}]} {
    %c0_i32 = arith.constant 0 : i32
    %0 = arith.cmpi eq, %arg1, %c0_i32 : i32
    %1 = arith.extui %0 : i1 to i32
    %c0_i32_0 = arith.constant 0 : i32
    %2 = arith.cmpi ne, %1, %c0_i32_0 : i32
    scf.if %2 {
      %cst_44 = arith.constant 0.000000e+00 : f32
      %179 = vector.broadcast %cst_44 : f32 to vector<8x32xf32>
      %c0_45 = arith.constant 0 : index
      %c0_46 = arith.constant 0 : index
      %180 = vector.load %arg5[%c0_45, %c0_46] : memref<8x32xf32, #tpu.memory_space<vmem>>, vector<8x32xf32>
      tpu.vector_store %arg5[%c0_45, %c0_46], %179 {strides = array<i32>} : memref<8x32xf32, #tpu.memory_space<vmem>>, vector<8x32xf32>,
      %cst_47 = arith.constant 0.000000e+00 : f32
      %181 = vector.broadcast %cst_47 : f32 to vector<8x32xf32>
      %c0_48 = arith.constant 0 : index
      %c0_49 = arith.constant 0 : index
      %182 = vector.load %arg6[%c0_48, %c0_49] : memref<8x32xf32, #tpu.memory_space<vmem>>, vector<8x32xf32>
      tpu.vector_store %arg6[%c0_48, %c0_49], %181 {strides = array<i32>} : memref<8x32xf32, #tpu.memory_space<vmem>>, vector<8x32xf32>,
    } else {
    }
    %c0 = arith.constant 0 : index
    %c0_1 = arith.constant 0 : index
    %3 = vector.load %arg3[%c0, %c0_1] : memref<32x128xf32, #tpu.memory_space<vmem>>, vector<32x128xf32>
    %c0_2 = arith.constant 0 : index
    %c0_3 = arith.constant 0 : index
    %4 = vector.load %arg5[%c0_2, %c0_3] : memref<8x32xf32, #tpu.memory_space<vmem>>, vector<8x32xf32>
    %c0_4 = arith.constant 0 : index
    %c0_5 = arith.constant 0 : index
    %5 = vector.load %arg6[%c0_4, %c0_5] : memref<8x32xf32, #tpu.memory_space<vmem>>, vector<8x32xf32>
    %c0_i32_6 = arith.constant 0 : i32
    %6 = arith.index_cast %c0_i32_6 : i32 to index
    %c0_7 = arith.constant 0 : index
    %c0_8 = arith.constant 0 : index
    %7 = vector.load %arg2[%6, %c0_7, %c0_8] : memref<8x8x128xf32, #tpu.memory_space<vmem>>, vector<1x8x128xf32>
    %8 = vector.shape_cast %7 : vector<1x8x128xf32> to vector<8x128xf32>
    %cst = arith.constant dense<0.000000e+00> : vector<8x128xf32>
    %9 = tpu.matmul %4, %3, %cst {dimension_numbers = #tpu.dot_dimension_numbers<[1], [0], [0], [1], [0, 0, 1, 1], [], []>} : vector<8x32xf32>, vector<32x128xf32>, vector<8x128xf32> -> vector<8x128xf32>
    %10 = arith.addf %8, %9 : vector<8x128xf32>
    %11 = vector.extract_strided_slice %10 {offsets = [0, 0], sizes = [8, 96], strides = [1, 1]} : vector<8x128xf32> to vector<8x96xf32>
    %12 = arith.negf %11 : vector<8x96xf32>
    %13 = math.exp %12 : vector<8x96xf32>
    %cst_9 = arith.constant 1.000000e+00 : f32
    %14 = vector.broadcast %cst_9 : f32 to vector<8x96xf32>
    %15 = arith.addf %14, %13 : vector<8x96xf32>
    %16 = arith.divf %14, %15 : vector<8x96xf32>
    %17 = vector.extract_strided_slice %16 {offsets = [0, 0], sizes = [8, 32], strides = [1, 1]} : vector<8x96xf32> to vector<8x32xf32>
    %18 = vector.extract_strided_slice %16 {offsets = [0, 32], sizes = [8, 32], strides = [1, 1]} : vector<8x96xf32> to vector<8x32xf32>
    %19 = vector.extract_strided_slice %16 {offsets = [0, 64], sizes = [8, 32], strides = [1, 1]} : vector<8x96xf32> to vector<8x32xf32>
    %20 = vector.extract_strided_slice %10 {offsets = [0, 96], sizes = [8, 32], strides = [1, 1]} : vector<8x128xf32> to vector<8x32xf32>
    %21 = math.tanh %20 : vector<8x32xf32>
    %22 = arith.mulf %18, %5 : vector<8x32xf32>
    %23 = arith.mulf %17, %21 : vector<8x32xf32>
    %24 = arith.addf %22, %23 : vector<8x32xf32>
    %25 = math.tanh %24 : vector<8x32xf32>
    %26 = arith.mulf %19, %25 : vector<8x32xf32>
    %c1_i32 = arith.constant 1 : i32
    %27 = arith.index_cast %c1_i32 : i32 to index
    %c0_10 = arith.constant 0 : index
    %c0_11 = arith.constant 0 : index
    %28 = vector.load %arg2[%27, %c0_10, %c0_11] : memref<8x8x128xf32, #tpu.memory_space<vmem>>, vector<1x8x128xf32>
    %29 = vector.shape_cast %28 : vector<1x8x128xf32> to vector<8x128xf32>
    %cst_12 = arith.constant dense<0.000000e+00> : vector<8x128xf32>
    %30 = tpu.matmul %26, %3, %cst_12 {dimension_numbers = #tpu.dot_dimension_numbers<[1], [0], [0], [1], [0, 0, 1, 1], [], []>} : vector<8x32xf32>, vector<32x128xf32>, vector<8x128xf32> -> vector<8x128xf32>
    %31 = arith.addf %29, %30 : vector<8x128xf32>
    %32 = vector.extract_strided_slice %31 {offsets = [0, 0], sizes = [8, 96], strides = [1, 1]} : vector<8x128xf32> to vector<8x96xf32>
    %33 = arith.negf %32 : vector<8x96xf32>
    %34 = math.exp %33 : vector<8x96xf32>
    %cst_13 = arith.constant 1.000000e+00 : f32
    %35 = vector.broadcast %cst_13 : f32 to vector<8x96xf32>
    %36 = arith.addf %35, %34 : vector<8x96xf32>
    %37 = arith.divf %35, %36 : vector<8x96xf32>
    %38 = vector.extract_strided_slice %37 {offsets = [0, 0], sizes = [8, 32], strides = [1, 1]} : vector<8x96xf32> to vector<8x32xf32>
    %39 = vector.extract_strided_slice %37 {offsets = [0, 32], sizes = [8, 32], strides = [1, 1]} : vector<8x96xf32> to vector<8x32xf32>
    %40 = vector.extract_strided_slice %37 {offsets = [0, 64], sizes = [8, 32], strides = [1, 1]} : vector<8x96xf32> to vector<8x32xf32>
    %41 = vector.extract_strided_slice %31 {offsets = [0, 96], sizes = [8, 32], strides = [1, 1]} : vector<8x128xf32> to vector<8x32xf32>
    %42 = math.tanh %41 : vector<8x32xf32>
    %43 = arith.mulf %39, %24 : vector<8x32xf32>
    %44 = arith.mulf %38, %42 : vector<8x32xf32>
    %45 = arith.addf %43, %44 : vector<8x32xf32>
    %46 = math.tanh %45 : vector<8x32xf32>
    %47 = arith.mulf %40, %46 : vector<8x32xf32>
    %c2_i32 = arith.constant 2 : i32
    %48 = arith.index_cast %c2_i32 : i32 to index
    %c0_14 = arith.constant 0 : index
    %c0_15 = arith.constant 0 : index
    %49 = vector.load %arg2[%48, %c0_14, %c0_15] : memref<8x8x128xf32, #tpu.memory_space<vmem>>, vector<1x8x128xf32>
    %50 = vector.shape_cast %49 : vector<1x8x128xf32> to vector<8x128xf32>
    %cst_16 = arith.constant dense<0.000000e+00> : vector<8x128xf32>
    %51 = tpu.matmul %47, %3, %cst_16 {dimension_numbers = #tpu.dot_dimension_numbers<[1], [0], [0], [1], [0, 0, 1, 1], [], []>} : vector<8x32xf32>, vector<32x128xf32>, vector<8x128xf32> -> vector<8x128xf32>
    %52 = arith.addf %50, %51 : vector<8x128xf32>
    %53 = vector.extract_strided_slice %52 {offsets = [0, 0], sizes = [8, 96], strides = [1, 1]} : vector<8x128xf32> to vector<8x96xf32>
    %54 = arith.negf %53 : vector<8x96xf32>
    %55 = math.exp %54 : vector<8x96xf32>
    %cst_17 = arith.constant 1.000000e+00 : f32
    %56 = vector.broadcast %cst_17 : f32 to vector<8x96xf32>
    %57 = arith.addf %56, %55 : vector<8x96xf32>
    %58 = arith.divf %56, %57 : vector<8x96xf32>
    %59 = vector.extract_strided_slice %58 {offsets = [0, 0], sizes = [8, 32], strides = [1, 1]} : vector<8x96xf32> to vector<8x32xf32>
    %60 = vector.extract_strided_slice %58 {offsets = [0, 32], sizes = [8, 32], strides = [1, 1]} : vector<8x96xf32> to vector<8x32xf32>
    %61 = vector.extract_strided_slice %58 {offsets = [0, 64], sizes = [8, 32], strides = [1, 1]} : vector<8x96xf32> to vector<8x32xf32>
    %62 = vector.extract_strided_slice %52 {offsets = [0, 96], sizes = [8, 32], strides = [1, 1]} : vector<8x128xf32> to vector<8x32xf32>
    %63 = math.tanh %62 : vector<8x32xf32>
    %64 = arith.mulf %60, %45 : vector<8x32xf32>
    %65 = arith.mulf %59, %63 : vector<8x32xf32>
    %66 = arith.addf %64, %65 : vector<8x32xf32>
    %67 = math.tanh %66 : vector<8x32xf32>
    %68 = arith.mulf %61, %67 : vector<8x32xf32>
    %c3_i32 = arith.constant 3 : i32
    %69 = arith.index_cast %c3_i32 : i32 to index
    %c0_18 = arith.constant 0 : index
    %c0_19 = arith.constant 0 : index
    %70 = vector.load %arg2[%69, %c0_18, %c0_19] : memref<8x8x128xf32, #tpu.memory_space<vmem>>, vector<1x8x128xf32>
    %71 = vector.shape_cast %70 : vector<1x8x128xf32> to vector<8x128xf32>
    %cst_20 = arith.constant dense<0.000000e+00> : vector<8x128xf32>
    %72 = tpu.matmul %68, %3, %cst_20 {dimension_numbers = #tpu.dot_dimension_numbers<[1], [0], [0], [1], [0, 0, 1, 1], [], []>} : vector<8x32xf32>, vector<32x128xf32>, vector<8x128xf32> -> vector<8x128xf32>
    %73 = arith.addf %71, %72 : vector<8x128xf32>
    %74 = vector.extract_strided_slice %73 {offsets = [0, 0], sizes = [8, 96], strides = [1, 1]} : vector<8x128xf32> to vector<8x96xf32>
    %75 = arith.negf %74 : vector<8x96xf32>
    %76 = math.exp %75 : vector<8x96xf32>
    %cst_21 = arith.constant 1.000000e+00 : f32
    %77 = vector.broadcast %cst_21 : f32 to vector<8x96xf32>
    %78 = arith.addf %77, %76 : vector<8x96xf32>
    %79 = arith.divf %77, %78 : vector<8x96xf32>
    %80 = vector.extract_strided_slice %79 {offsets = [0, 0], sizes = [8, 32], strides = [1, 1]} : vector<8x96xf32> to vector<8x32xf32>
    %81 = vector.extract_strided_slice %79 {offsets = [0, 32], sizes = [8, 32], strides = [1, 1]} : vector<8x96xf32> to vector<8x32xf32>
    %82 = vector.extract_strided_slice %79 {offsets = [0, 64], sizes = [8, 32], strides = [1, 1]} : vector<8x96xf32> to vector<8x32xf32>
    %83 = vector.extract_strided_slice %73 {offsets = [0, 96], sizes = [8, 32], strides = [1, 1]} : vector<8x128xf32> to vector<8x32xf32>
    %84 = math.tanh %83 : vector<8x32xf32>
    %85 = arith.mulf %81, %66 : vector<8x32xf32>
    %86 = arith.mulf %80, %84 : vector<8x32xf32>
    %87 = arith.addf %85, %86 : vector<8x32xf32>
    %88 = math.tanh %87 : vector<8x32xf32>
    %89 = arith.mulf %82, %88 : vector<8x32xf32>
    %c4_i32 = arith.constant 4 : i32
    %90 = arith.index_cast %c4_i32 : i32 to index
    %c0_22 = arith.constant 0 : index
    %c0_23 = arith.constant 0 : index
    %91 = vector.load %arg2[%90, %c0_22, %c0_23] : memref<8x8x128xf32, #tpu.memory_space<vmem>>, vector<1x8x128xf32>
    %92 = vector.shape_cast %91 : vector<1x8x128xf32> to vector<8x128xf32>
    %cst_24 = arith.constant dense<0.000000e+00> : vector<8x128xf32>
    %93 = tpu.matmul %89, %3, %cst_24 {dimension_numbers = #tpu.dot_dimension_numbers<[1], [0], [0], [1], [0, 0, 1, 1], [], []>} : vector<8x32xf32>, vector<32x128xf32>, vector<8x128xf32> -> vector<8x128xf32>
    %94 = arith.addf %92, %93 : vector<8x128xf32>
    %95 = vector.extract_strided_slice %94 {offsets = [0, 0], sizes = [8, 96], strides = [1, 1]} : vector<8x128xf32> to vector<8x96xf32>
    %96 = arith.negf %95 : vector<8x96xf32>
    %97 = math.exp %96 : vector<8x96xf32>
    %cst_25 = arith.constant 1.000000e+00 : f32
    %98 = vector.broadcast %cst_25 : f32 to vector<8x96xf32>
    %99 = arith.addf %98, %97 : vector<8x96xf32>
    %100 = arith.divf %98, %99 : vector<8x96xf32>
    %101 = vector.extract_strided_slice %100 {offsets = [0, 0], sizes = [8, 32], strides = [1, 1]} : vector<8x96xf32> to vector<8x32xf32>
    %102 = vector.extract_strided_slice %100 {offsets = [0, 32], sizes = [8, 32], strides = [1, 1]} : vector<8x96xf32> to vector<8x32xf32>
    %103 = vector.extract_strided_slice %100 {offsets = [0, 64], sizes = [8, 32], strides = [1, 1]} : vector<8x96xf32> to vector<8x32xf32>
    %104 = vector.extract_strided_slice %94 {offsets = [0, 96], sizes = [8, 32], strides = [1, 1]} : vector<8x128xf32> to vector<8x32xf32>
    %105 = math.tanh %104 : vector<8x32xf32>
    %106 = arith.mulf %102, %87 : vector<8x32xf32>
    %107 = arith.mulf %101, %105 : vector<8x32xf32>
    %108 = arith.addf %106, %107 : vector<8x32xf32>
    %109 = math.tanh %108 : vector<8x32xf32>
    %110 = arith.mulf %103, %109 : vector<8x32xf32>
    %c5_i32 = arith.constant 5 : i32
    %111 = arith.index_cast %c5_i32 : i32 to index
    %c0_26 = arith.constant 0 : index
    %c0_27 = arith.constant 0 : index
    %112 = vector.load %arg2[%111, %c0_26, %c0_27] : memref<8x8x128xf32, #tpu.memory_space<vmem>>, vector<1x8x128xf32>
    %113 = vector.shape_cast %112 : vector<1x8x128xf32> to vector<8x128xf32>
    %cst_28 = arith.constant dense<0.000000e+00> : vector<8x128xf32>
    %114 = tpu.matmul %110, %3, %cst_28 {dimension_numbers = #tpu.dot_dimension_numbers<[1], [0], [0], [1], [0, 0, 1, 1], [], []>} : vector<8x32xf32>, vector<32x128xf32>, vector<8x128xf32> -> vector<8x128xf32>
    %115 = arith.addf %113, %114 : vector<8x128xf32>
    %116 = vector.extract_strided_slice %115 {offsets = [0, 0], sizes = [8, 96], strides = [1, 1]} : vector<8x128xf32> to vector<8x96xf32>
    %117 = arith.negf %116 : vector<8x96xf32>
    %118 = math.exp %117 : vector<8x96xf32>
    %cst_29 = arith.constant 1.000000e+00 : f32
    %119 = vector.broadcast %cst_29 : f32 to vector<8x96xf32>
    %120 = arith.addf %119, %118 : vector<8x96xf32>
    %121 = arith.divf %119, %120 : vector<8x96xf32>
    %122 = vector.extract_strided_slice %121 {offsets = [0, 0], sizes = [8, 32], strides = [1, 1]} : vector<8x96xf32> to vector<8x32xf32>
    %123 = vector.extract_strided_slice %121 {offsets = [0, 32], sizes = [8, 32], strides = [1, 1]} : vector<8x96xf32> to vector<8x32xf32>
    %124 = vector.extract_strided_slice %121 {offsets = [0, 64], sizes = [8, 32], strides = [1, 1]} : vector<8x96xf32> to vector<8x32xf32>
    %125 = vector.extract_strided_slice %115 {offsets = [0, 96], sizes = [8, 32], strides = [1, 1]} : vector<8x128xf32> to vector<8x32xf32>
    %126 = math.tanh %125 : vector<8x32xf32>
    %127 = arith.mulf %123, %108 : vector<8x32xf32>
    %128 = arith.mulf %122, %126 : vector<8x32xf32>
    %129 = arith.addf %127, %128 : vector<8x32xf32>
    %130 = math.tanh %129 : vector<8x32xf32>
    %131 = arith.mulf %124, %130 : vector<8x32xf32>
    %c6_i32 = arith.constant 6 : i32
    %132 = arith.index_cast %c6_i32 : i32 to index
    %c0_30 = arith.constant 0 : index
    %c0_31 = arith.constant 0 : index
    %133 = vector.load %arg2[%132, %c0_30, %c0_31] : memref<8x8x128xf32, #tpu.memory_space<vmem>>, vector<1x8x128xf32>
    %134 = vector.shape_cast %133 : vector<1x8x128xf32> to vector<8x128xf32>
    %cst_32 = arith.constant dense<0.000000e+00> : vector<8x128xf32>
    %135 = tpu.matmul %131, %3, %cst_32 {dimension_numbers = #tpu.dot_dimension_numbers<[1], [0], [0], [1], [0, 0, 1, 1], [], []>} : vector<8x32xf32>, vector<32x128xf32>, vector<8x128xf32> -> vector<8x128xf32>
    %136 = arith.addf %134, %135 : vector<8x128xf32>
    %137 = vector.extract_strided_slice %136 {offsets = [0, 0], sizes = [8, 96], strides = [1, 1]} : vector<8x128xf32> to vector<8x96xf32>
    %138 = arith.negf %137 : vector<8x96xf32>
    %139 = math.exp %138 : vector<8x96xf32>
    %cst_33 = arith.constant 1.000000e+00 : f32
    %140 = vector.broadcast %cst_33 : f32 to vector<8x96xf32>
    %141 = arith.addf %140, %139 : vector<8x96xf32>
    %142 = arith.divf %140, %141 : vector<8x96xf32>
    %143 = vector.extract_strided_slice %142 {offsets = [0, 0], sizes = [8, 32], strides = [1, 1]} : vector<8x96xf32> to vector<8x32xf32>
    %144 = vector.extract_strided_slice %142 {offsets = [0, 32], sizes = [8, 32], strides = [1, 1]} : vector<8x96xf32> to vector<8x32xf32>
    %145 = vector.extract_strided_slice %142 {offsets = [0, 64], sizes = [8, 32], strides = [1, 1]} : vector<8x96xf32> to vector<8x32xf32>
    %146 = vector.extract_strided_slice %136 {offsets = [0, 96], sizes = [8, 32], strides = [1, 1]} : vector<8x128xf32> to vector<8x32xf32>
    %147 = math.tanh %146 : vector<8x32xf32>
    %148 = arith.mulf %144, %129 : vector<8x32xf32>
    %149 = arith.mulf %143, %147 : vector<8x32xf32>
    %150 = arith.addf %148, %149 : vector<8x32xf32>
    %151 = math.tanh %150 : vector<8x32xf32>
    %152 = arith.mulf %145, %151 : vector<8x32xf32>
    %c7_i32 = arith.constant 7 : i32
    %153 = arith.index_cast %c7_i32 : i32 to index
    %c0_34 = arith.constant 0 : index
    %c0_35 = arith.constant 0 : index
    %154 = vector.load %arg2[%153, %c0_34, %c0_35] : memref<8x8x128xf32, #tpu.memory_space<vmem>>, vector<1x8x128xf32>
    %155 = vector.shape_cast %154 : vector<1x8x128xf32> to vector<8x128xf32>
    %cst_36 = arith.constant dense<0.000000e+00> : vector<8x128xf32>
    %156 = tpu.matmul %152, %3, %cst_36 {dimension_numbers = #tpu.dot_dimension_numbers<[1], [0], [0], [1], [0, 0, 1, 1], [], []>} : vector<8x32xf32>, vector<32x128xf32>, vector<8x128xf32> -> vector<8x128xf32>
    %157 = arith.addf %155, %156 : vector<8x128xf32>
    %158 = vector.extract_strided_slice %157 {offsets = [0, 0], sizes = [8, 96], strides = [1, 1]} : vector<8x128xf32> to vector<8x96xf32>
    %159 = arith.negf %158 : vector<8x96xf32>
    %160 = math.exp %159 : vector<8x96xf32>
    %cst_37 = arith.constant 1.000000e+00 : f32
    %161 = vector.broadcast %cst_37 : f32 to vector<8x96xf32>
    %162 = arith.addf %161, %160 : vector<8x96xf32>
    %163 = arith.divf %161, %162 : vector<8x96xf32>
    %164 = vector.extract_strided_slice %163 {offsets = [0, 0], sizes = [8, 32], strides = [1, 1]} : vector<8x96xf32> to vector<8x32xf32>
    %165 = vector.extract_strided_slice %163 {offsets = [0, 32], sizes = [8, 32], strides = [1, 1]} : vector<8x96xf32> to vector<8x32xf32>
    %166 = vector.extract_strided_slice %163 {offsets = [0, 64], sizes = [8, 32], strides = [1, 1]} : vector<8x96xf32> to vector<8x32xf32>
    %167 = vector.extract_strided_slice %157 {offsets = [0, 96], sizes = [8, 32], strides = [1, 1]} : vector<8x128xf32> to vector<8x32xf32>
    %168 = math.tanh %167 : vector<8x32xf32>
    %169 = arith.mulf %165, %150 : vector<8x32xf32>
    %170 = arith.mulf %164, %168 : vector<8x32xf32>
    %171 = arith.addf %169, %170 : vector<8x32xf32>
    %172 = math.tanh %171 : vector<8x32xf32>
    %173 = arith.mulf %166, %172 : vector<8x32xf32>
    %c8_i32 = arith.constant 8 : i32
    %c0_38 = arith.constant 0 : index
    %c0_39 = arith.constant 0 : index
    %174 = vector.load %arg5[%c0_38, %c0_39] : memref<8x32xf32, #tpu.memory_space<vmem>>, vector<8x32xf32>
    tpu.vector_store %arg5[%c0_38, %c0_39], %173 {strides = array<i32>} : memref<8x32xf32, #tpu.memory_space<vmem>>, vector<8x32xf32>,
    %c0_40 = arith.constant 0 : index
    %c0_41 = arith.constant 0 : index
    %175 = vector.load %arg6[%c0_40, %c0_41] : memref<8x32xf32, #tpu.memory_space<vmem>>, vector<8x32xf32>
    tpu.vector_store %arg6[%c0_40, %c0_41], %171 {strides = array<i32>} : memref<8x32xf32, #tpu.memory_space<vmem>>, vector<8x32xf32>,
    %c0_i32_42 = arith.constant 0 : i32
    %176 = arith.cmpi eq, %arg1, %c0_i32_42 : i32
    %177 = arith.extui %176 : i1 to i32
    %c0_i32_43 = arith.constant 0 : i32
    %178 = arith.cmpi ne, %177, %c0_i32_43 : i32
    scf.if %178 {
      %c0_44 = arith.constant 0 : index
      %c0_45 = arith.constant 0 : index
      %179 = vector.load %arg4[%c0_44, %c0_45] : memref<8x32xf32, #tpu.memory_space<vmem>>, vector<8x32xf32>
      tpu.vector_store %arg4[%c0_44, %c0_45], %173 {strides = array<i32>} : memref<8x32xf32, #tpu.memory_space<vmem>>, vector<8x32xf32>,
    } else {
    }
    return
  }
  func.func @transform_0(%arg0: i32, %arg1: i32) -> (i32, i32, i32) {
    %c0_i32 = arith.constant 0 : i32
    %c0_i32_0 = arith.constant 0 : i32
    return %arg1, %arg0, %c0_i32 : i32, i32, i32
  }
  func.func @transform_1(%arg0: i32, %arg1: i32) -> (i32, i32) {
    %c0_i32 = arith.constant 0 : i32
    %c0_i32_0 = arith.constant 0 : i32
    %c0_i32_1 = arith.constant 0 : i32
    return %c0_i32, %c0_i32_0 : i32, i32
  }
  func.func @transform_2(%arg0: i32, %arg1: i32) -> (i32, i32) {
    %c0_i32 = arith.constant 0 : i32
    %c0_i32_0 = arith.constant 0 : i32
    return %arg0, %c0_i32 : i32, i32
  }
}

module attributes {stable_mosaic.version = 11 : i64} {
  func.func @_lstm_recurrent_kernel(%arg0: i32, %arg1: i32, %arg2: memref<8x8x128xf32, #tpu.memory_space<vmem>>, %arg3: memref<32x128xf32, #tpu.memory_space<vmem>>, %arg4: memref<8x32xf32, #tpu.memory_space<vmem>>, %arg5: memref<8x32xf32, #tpu.memory_space<vmem>>, %arg6: memref<8x32xf32, #tpu.memory_space<vmem>>) attributes {dimension_semantics = [#tpu.dimension_semantics<parallel>, #tpu.dimension_semantics<arbitrary>], iteration_bounds = array<i64: 1, 1>, scalar_prefetch = 0 : i64, scratch_operands = 2 : i64, tpu.core_type = #tpu.core_type<tc>, window_params = [{transform_indices = @transform_0, window_bounds = array<i64: 8, 8, 128>}, {pipeline_mode = #tpu.pipeline_mode<synchronous>, transform_indices = @transform_1, window_bounds = array<i64: 32, 128>}, {transform_indices = @transform_2, window_bounds = array<i64: 8, 32>}]} {
    %c0_i32 = arith.constant 0 : i32
    %0 = arith.cmpi eq, %arg1, %c0_i32 : i32
    %1 = arith.extui %0 : i1 to i32
    %c0_i32_0 = arith.constant 0 : i32
    %2 = arith.cmpi ne, %1, %c0_i32_0 : i32
    scf.if %2 {
      %cst_44 = arith.constant 0.000000e+00 : f32
      %179 = vector.broadcast %cst_44 : f32 to vector<8x32xf32>
      %c0_45 = arith.constant 0 : index
      %c0_46 = arith.constant 0 : index
      %180 = vector.load %arg5[%c0_45, %c0_46] : memref<8x32xf32, #tpu.memory_space<vmem>>, vector<8x32xf32>
      tpu.vector_store %arg5[%c0_45, %c0_46], %179 {strides = array<i32>} : memref<8x32xf32, #tpu.memory_space<vmem>>, vector<8x32xf32>,
      %cst_47 = arith.constant 0.000000e+00 : f32
      %181 = vector.broadcast %cst_47 : f32 to vector<8x32xf32>
      %c0_48 = arith.constant 0 : index
      %c0_49 = arith.constant 0 : index
      %182 = vector.load %arg6[%c0_48, %c0_49] : memref<8x32xf32, #tpu.memory_space<vmem>>, vector<8x32xf32>
      tpu.vector_store %arg6[%c0_48, %c0_49], %181 {strides = array<i32>} : memref<8x32xf32, #tpu.memory_space<vmem>>, vector<8x32xf32>,
    } else {
    }
    %c0 = arith.constant 0 : index
    %c0_1 = arith.constant 0 : index
    %3 = vector.load %arg3[%c0, %c0_1] : memref<32x128xf32, #tpu.memory_space<vmem>>, vector<32x128xf32>
    %c0_2 = arith.constant 0 : index
    %c0_3 = arith.constant 0 : index
    %4 = vector.load %arg5[%c0_2, %c0_3] : memref<8x32xf32, #tpu.memory_space<vmem>>, vector<8x32xf32>
    %c0_4 = arith.constant 0 : index
    %c0_5 = arith.constant 0 : index
    %5 = vector.load %arg6[%c0_4, %c0_5] : memref<8x32xf32, #tpu.memory_space<vmem>>, vector<8x32xf32>
    %c0_i32_6 = arith.constant 0 : i32
    %6 = arith.index_cast %c0_i32_6 : i32 to index
    %c0_7 = arith.constant 0 : index
    %c0_8 = arith.constant 0 : index
    %7 = vector.load %arg2[%6, %c0_7, %c0_8] : memref<8x8x128xf32, #tpu.memory_space<vmem>>, vector<1x8x128xf32>
    %8 = vector.shape_cast %7 : vector<1x8x128xf32> to vector<8x128xf32>
    %cst = arith.constant dense<0.000000e+00> : vector<8x128xf32>
    %9 = tpu.matmul %4, %3, %cst {dimension_numbers = #tpu.dot_dimension_numbers<[1], [0], [0], [1], [0, 0, 1, 1], [], []>} : vector<8x32xf32>, vector<32x128xf32>, vector<8x128xf32> -> vector<8x128xf32>
    %10 = arith.addf %8, %9 : vector<8x128xf32>
    %11 = vector.extract_strided_slice %10 {offsets = [0, 0], sizes = [8, 96], strides = [1, 1]} : vector<8x128xf32> to vector<8x96xf32>
    %12 = arith.negf %11 : vector<8x96xf32>
    %13 = math.exp %12 : vector<8x96xf32>
    %cst_9 = arith.constant 1.000000e+00 : f32
    %14 = vector.broadcast %cst_9 : f32 to vector<8x96xf32>
    %15 = arith.addf %14, %13 : vector<8x96xf32>
    %16 = arith.divf %14, %15 : vector<8x96xf32>
    %17 = vector.extract_strided_slice %16 {offsets = [0, 0], sizes = [8, 32], strides = [1, 1]} : vector<8x96xf32> to vector<8x32xf32>
    %18 = vector.extract_strided_slice %16 {offsets = [0, 32], sizes = [8, 32], strides = [1, 1]} : vector<8x96xf32> to vector<8x32xf32>
    %19 = vector.extract_strided_slice %16 {offsets = [0, 64], sizes = [8, 32], strides = [1, 1]} : vector<8x96xf32> to vector<8x32xf32>
    %20 = vector.extract_strided_slice %10 {offsets = [0, 96], sizes = [8, 32], strides = [1, 1]} : vector<8x128xf32> to vector<8x32xf32>
    %21 = math.tanh %20 : vector<8x32xf32>
    %22 = arith.mulf %18, %5 : vector<8x32xf32>
    %23 = arith.mulf %17, %21 : vector<8x32xf32>
    %24 = arith.addf %22, %23 : vector<8x32xf32>
    %25 = math.tanh %24 : vector<8x32xf32>
    %26 = arith.mulf %19, %25 : vector<8x32xf32>
    %c1_i32 = arith.constant 1 : i32
    %27 = arith.index_cast %c1_i32 : i32 to index
    %c0_10 = arith.constant 0 : index
    %c0_11 = arith.constant 0 : index
    %28 = vector.load %arg2[%27, %c0_10, %c0_11] : memref<8x8x128xf32, #tpu.memory_space<vmem>>, vector<1x8x128xf32>
    %29 = vector.shape_cast %28 : vector<1x8x128xf32> to vector<8x128xf32>
    %cst_12 = arith.constant dense<0.000000e+00> : vector<8x128xf32>
    %30 = tpu.matmul %26, %3, %cst_12 {dimension_numbers = #tpu.dot_dimension_numbers<[1], [0], [0], [1], [0, 0, 1, 1], [], []>} : vector<8x32xf32>, vector<32x128xf32>, vector<8x128xf32> -> vector<8x128xf32>
    %31 = arith.addf %29, %30 : vector<8x128xf32>
    %32 = vector.extract_strided_slice %31 {offsets = [0, 0], sizes = [8, 96], strides = [1, 1]} : vector<8x128xf32> to vector<8x96xf32>
    %33 = arith.negf %32 : vector<8x96xf32>
    %34 = math.exp %33 : vector<8x96xf32>
    %cst_13 = arith.constant 1.000000e+00 : f32
    %35 = vector.broadcast %cst_13 : f32 to vector<8x96xf32>
    %36 = arith.addf %35, %34 : vector<8x96xf32>
    %37 = arith.divf %35, %36 : vector<8x96xf32>
    %38 = vector.extract_strided_slice %37 {offsets = [0, 0], sizes = [8, 32], strides = [1, 1]} : vector<8x96xf32> to vector<8x32xf32>
    %39 = vector.extract_strided_slice %37 {offsets = [0, 32], sizes = [8, 32], strides = [1, 1]} : vector<8x96xf32> to vector<8x32xf32>
    %40 = vector.extract_strided_slice %37 {offsets = [0, 64], sizes = [8, 32], strides = [1, 1]} : vector<8x96xf32> to vector<8x32xf32>
    %41 = vector.extract_strided_slice %31 {offsets = [0, 96], sizes = [8, 32], strides = [1, 1]} : vector<8x128xf32> to vector<8x32xf32>
    %42 = math.tanh %41 : vector<8x32xf32>
    %43 = arith.mulf %39, %24 : vector<8x32xf32>
    %44 = arith.mulf %38, %42 : vector<8x32xf32>
    %45 = arith.addf %43, %44 : vector<8x32xf32>
    %46 = math.tanh %45 : vector<8x32xf32>
    %47 = arith.mulf %40, %46 : vector<8x32xf32>
    %c2_i32 = arith.constant 2 : i32
    %48 = arith.index_cast %c2_i32 : i32 to index
    %c0_14 = arith.constant 0 : index
    %c0_15 = arith.constant 0 : index
    %49 = vector.load %arg2[%48, %c0_14, %c0_15] : memref<8x8x128xf32, #tpu.memory_space<vmem>>, vector<1x8x128xf32>
    %50 = vector.shape_cast %49 : vector<1x8x128xf32> to vector<8x128xf32>
    %cst_16 = arith.constant dense<0.000000e+00> : vector<8x128xf32>
    %51 = tpu.matmul %47, %3, %cst_16 {dimension_numbers = #tpu.dot_dimension_numbers<[1], [0], [0], [1], [0, 0, 1, 1], [], []>} : vector<8x32xf32>, vector<32x128xf32>, vector<8x128xf32> -> vector<8x128xf32>
    %52 = arith.addf %50, %51 : vector<8x128xf32>
    %53 = vector.extract_strided_slice %52 {offsets = [0, 0], sizes = [8, 96], strides = [1, 1]} : vector<8x128xf32> to vector<8x96xf32>
    %54 = arith.negf %53 : vector<8x96xf32>
    %55 = math.exp %54 : vector<8x96xf32>
    %cst_17 = arith.constant 1.000000e+00 : f32
    %56 = vector.broadcast %cst_17 : f32 to vector<8x96xf32>
    %57 = arith.addf %56, %55 : vector<8x96xf32>
    %58 = arith.divf %56, %57 : vector<8x96xf32>
    %59 = vector.extract_strided_slice %58 {offsets = [0, 0], sizes = [8, 32], strides = [1, 1]} : vector<8x96xf32> to vector<8x32xf32>
    %60 = vector.extract_strided_slice %58 {offsets = [0, 32], sizes = [8, 32], strides = [1, 1]} : vector<8x96xf32> to vector<8x32xf32>
    %61 = vector.extract_strided_slice %58 {offsets = [0, 64], sizes = [8, 32], strides = [1, 1]} : vector<8x96xf32> to vector<8x32xf32>
    %62 = vector.extract_strided_slice %52 {offsets = [0, 96], sizes = [8, 32], strides = [1, 1]} : vector<8x128xf32> to vector<8x32xf32>
    %63 = math.tanh %62 : vector<8x32xf32>
    %64 = arith.mulf %60, %45 : vector<8x32xf32>
    %65 = arith.mulf %59, %63 : vector<8x32xf32>
    %66 = arith.addf %64, %65 : vector<8x32xf32>
    %67 = math.tanh %66 : vector<8x32xf32>
    %68 = arith.mulf %61, %67 : vector<8x32xf32>
    %c3_i32 = arith.constant 3 : i32
    %69 = arith.index_cast %c3_i32 : i32 to index
    %c0_18 = arith.constant 0 : index
    %c0_19 = arith.constant 0 : index
    %70 = vector.load %arg2[%69, %c0_18, %c0_19] : memref<8x8x128xf32, #tpu.memory_space<vmem>>, vector<1x8x128xf32>
    %71 = vector.shape_cast %70 : vector<1x8x128xf32> to vector<8x128xf32>
    %cst_20 = arith.constant dense<0.000000e+00> : vector<8x128xf32>
    %72 = tpu.matmul %68, %3, %cst_20 {dimension_numbers = #tpu.dot_dimension_numbers<[1], [0], [0], [1], [0, 0, 1, 1], [], []>} : vector<8x32xf32>, vector<32x128xf32>, vector<8x128xf32> -> vector<8x128xf32>
    %73 = arith.addf %71, %72 : vector<8x128xf32>
    %74 = vector.extract_strided_slice %73 {offsets = [0, 0], sizes = [8, 96], strides = [1, 1]} : vector<8x128xf32> to vector<8x96xf32>
    %75 = arith.negf %74 : vector<8x96xf32>
    %76 = math.exp %75 : vector<8x96xf32>
    %cst_21 = arith.constant 1.000000e+00 : f32
    %77 = vector.broadcast %cst_21 : f32 to vector<8x96xf32>
    %78 = arith.addf %77, %76 : vector<8x96xf32>
    %79 = arith.divf %77, %78 : vector<8x96xf32>
    %80 = vector.extract_strided_slice %79 {offsets = [0, 0], sizes = [8, 32], strides = [1, 1]} : vector<8x96xf32> to vector<8x32xf32>
    %81 = vector.extract_strided_slice %79 {offsets = [0, 32], sizes = [8, 32], strides = [1, 1]} : vector<8x96xf32> to vector<8x32xf32>
    %82 = vector.extract_strided_slice %79 {offsets = [0, 64], sizes = [8, 32], strides = [1, 1]} : vector<8x96xf32> to vector<8x32xf32>
    %83 = vector.extract_strided_slice %73 {offsets = [0, 96], sizes = [8, 32], strides = [1, 1]} : vector<8x128xf32> to vector<8x32xf32>
    %84 = math.tanh %83 : vector<8x32xf32>
    %85 = arith.mulf %81, %66 : vector<8x32xf32>
    %86 = arith.mulf %80, %84 : vector<8x32xf32>
    %87 = arith.addf %85, %86 : vector<8x32xf32>
    %88 = math.tanh %87 : vector<8x32xf32>
    %89 = arith.mulf %82, %88 : vector<8x32xf32>
    %c4_i32 = arith.constant 4 : i32
    %90 = arith.index_cast %c4_i32 : i32 to index
    %c0_22 = arith.constant 0 : index
    %c0_23 = arith.constant 0 : index
    %91 = vector.load %arg2[%90, %c0_22, %c0_23] : memref<8x8x128xf32, #tpu.memory_space<vmem>>, vector<1x8x128xf32>
    %92 = vector.shape_cast %91 : vector<1x8x128xf32> to vector<8x128xf32>
    %cst_24 = arith.constant dense<0.000000e+00> : vector<8x128xf32>
    %93 = tpu.matmul %89, %3, %cst_24 {dimension_numbers = #tpu.dot_dimension_numbers<[1], [0], [0], [1], [0, 0, 1, 1], [], []>} : vector<8x32xf32>, vector<32x128xf32>, vector<8x128xf32> -> vector<8x128xf32>
    %94 = arith.addf %92, %93 : vector<8x128xf32>
    %95 = vector.extract_strided_slice %94 {offsets = [0, 0], sizes = [8, 96], strides = [1, 1]} : vector<8x128xf32> to vector<8x96xf32>
    %96 = arith.negf %95 : vector<8x96xf32>
    %97 = math.exp %96 : vector<8x96xf32>
    %cst_25 = arith.constant 1.000000e+00 : f32
    %98 = vector.broadcast %cst_25 : f32 to vector<8x96xf32>
    %99 = arith.addf %98, %97 : vector<8x96xf32>
    %100 = arith.divf %98, %99 : vector<8x96xf32>
    %101 = vector.extract_strided_slice %100 {offsets = [0, 0], sizes = [8, 32], strides = [1, 1]} : vector<8x96xf32> to vector<8x32xf32>
    %102 = vector.extract_strided_slice %100 {offsets = [0, 32], sizes = [8, 32], strides = [1, 1]} : vector<8x96xf32> to vector<8x32xf32>
    %103 = vector.extract_strided_slice %100 {offsets = [0, 64], sizes = [8, 32], strides = [1, 1]} : vector<8x96xf32> to vector<8x32xf32>
    %104 = vector.extract_strided_slice %94 {offsets = [0, 96], sizes = [8, 32], strides = [1, 1]} : vector<8x128xf32> to vector<8x32xf32>
    %105 = math.tanh %104 : vector<8x32xf32>
    %106 = arith.mulf %102, %87 : vector<8x32xf32>
    %107 = arith.mulf %101, %105 : vector<8x32xf32>
    %108 = arith.addf %106, %107 : vector<8x32xf32>
    %109 = math.tanh %108 : vector<8x32xf32>
    %110 = arith.mulf %103, %109 : vector<8x32xf32>
    %c5_i32 = arith.constant 5 : i32
    %111 = arith.index_cast %c5_i32 : i32 to index
    %c0_26 = arith.constant 0 : index
    %c0_27 = arith.constant 0 : index
    %112 = vector.load %arg2[%111, %c0_26, %c0_27] : memref<8x8x128xf32, #tpu.memory_space<vmem>>, vector<1x8x128xf32>
    %113 = vector.shape_cast %112 : vector<1x8x128xf32> to vector<8x128xf32>
    %cst_28 = arith.constant dense<0.000000e+00> : vector<8x128xf32>
    %114 = tpu.matmul %110, %3, %cst_28 {dimension_numbers = #tpu.dot_dimension_numbers<[1], [0], [0], [1], [0, 0, 1, 1], [], []>} : vector<8x32xf32>, vector<32x128xf32>, vector<8x128xf32> -> vector<8x128xf32>
    %115 = arith.addf %113, %114 : vector<8x128xf32>
    %116 = vector.extract_strided_slice %115 {offsets = [0, 0], sizes = [8, 96], strides = [1, 1]} : vector<8x128xf32> to vector<8x96xf32>
    %117 = arith.negf %116 : vector<8x96xf32>
    %118 = math.exp %117 : vector<8x96xf32>
    %cst_29 = arith.constant 1.000000e+00 : f32
    %119 = vector.broadcast %cst_29 : f32 to vector<8x96xf32>
    %120 = arith.addf %119, %118 : vector<8x96xf32>
    %121 = arith.divf %119, %120 : vector<8x96xf32>
    %122 = vector.extract_strided_slice %121 {offsets = [0, 0], sizes = [8, 32], strides = [1, 1]} : vector<8x96xf32> to vector<8x32xf32>
    %123 = vector.extract_strided_slice %121 {offsets = [0, 32], sizes = [8, 32], strides = [1, 1]} : vector<8x96xf32> to vector<8x32xf32>
    %124 = vector.extract_strided_slice %121 {offsets = [0, 64], sizes = [8, 32], strides = [1, 1]} : vector<8x96xf32> to vector<8x32xf32>
    %125 = vector.extract_strided_slice %115 {offsets = [0, 96], sizes = [8, 32], strides = [1, 1]} : vector<8x128xf32> to vector<8x32xf32>
    %126 = math.tanh %125 : vector<8x32xf32>
    %127 = arith.mulf %123, %108 : vector<8x32xf32>
    %128 = arith.mulf %122, %126 : vector<8x32xf32>
    %129 = arith.addf %127, %128 : vector<8x32xf32>
    %130 = math.tanh %129 : vector<8x32xf32>
    %131 = arith.mulf %124, %130 : vector<8x32xf32>
    %c6_i32 = arith.constant 6 : i32
    %132 = arith.index_cast %c6_i32 : i32 to index
    %c0_30 = arith.constant 0 : index
    %c0_31 = arith.constant 0 : index
    %133 = vector.load %arg2[%132, %c0_30, %c0_31] : memref<8x8x128xf32, #tpu.memory_space<vmem>>, vector<1x8x128xf32>
    %134 = vector.shape_cast %133 : vector<1x8x128xf32> to vector<8x128xf32>
    %cst_32 = arith.constant dense<0.000000e+00> : vector<8x128xf32>
    %135 = tpu.matmul %131, %3, %cst_32 {dimension_numbers = #tpu.dot_dimension_numbers<[1], [0], [0], [1], [0, 0, 1, 1], [], []>} : vector<8x32xf32>, vector<32x128xf32>, vector<8x128xf32> -> vector<8x128xf32>
    %136 = arith.addf %134, %135 : vector<8x128xf32>
    %137 = vector.extract_strided_slice %136 {offsets = [0, 0], sizes = [8, 96], strides = [1, 1]} : vector<8x128xf32> to vector<8x96xf32>
    %138 = arith.negf %137 : vector<8x96xf32>
    %139 = math.exp %138 : vector<8x96xf32>
    %cst_33 = arith.constant 1.000000e+00 : f32
    %140 = vector.broadcast %cst_33 : f32 to vector<8x96xf32>
    %141 = arith.addf %140, %139 : vector<8x96xf32>
    %142 = arith.divf %140, %141 : vector<8x96xf32>
    %143 = vector.extract_strided_slice %142 {offsets = [0, 0], sizes = [8, 32], strides = [1, 1]} : vector<8x96xf32> to vector<8x32xf32>
    %144 = vector.extract_strided_slice %142 {offsets = [0, 32], sizes = [8, 32], strides = [1, 1]} : vector<8x96xf32> to vector<8x32xf32>
    %145 = vector.extract_strided_slice %142 {offsets = [0, 64], sizes = [8, 32], strides = [1, 1]} : vector<8x96xf32> to vector<8x32xf32>
    %146 = vector.extract_strided_slice %136 {offsets = [0, 96], sizes = [8, 32], strides = [1, 1]} : vector<8x128xf32> to vector<8x32xf32>
    %147 = math.tanh %146 : vector<8x32xf32>
    %148 = arith.mulf %144, %129 : vector<8x32xf32>
    %149 = arith.mulf %143, %147 : vector<8x32xf32>
    %150 = arith.addf %148, %149 : vector<8x32xf32>
    %151 = math.tanh %150 : vector<8x32xf32>
    %152 = arith.mulf %145, %151 : vector<8x32xf32>
    %c7_i32 = arith.constant 7 : i32
    %153 = arith.index_cast %c7_i32 : i32 to index
    %c0_34 = arith.constant 0 : index
    %c0_35 = arith.constant 0 : index
    %154 = vector.load %arg2[%153, %c0_34, %c0_35] : memref<8x8x128xf32, #tpu.memory_space<vmem>>, vector<1x8x128xf32>
    %155 = vector.shape_cast %154 : vector<1x8x128xf32> to vector<8x128xf32>
    %cst_36 = arith.constant dense<0.000000e+00> : vector<8x128xf32>
    %156 = tpu.matmul %152, %3, %cst_36 {dimension_numbers = #tpu.dot_dimension_numbers<[1], [0], [0], [1], [0, 0, 1, 1], [], []>} : vector<8x32xf32>, vector<32x128xf32>, vector<8x128xf32> -> vector<8x128xf32>
    %157 = arith.addf %155, %156 : vector<8x128xf32>
    %158 = vector.extract_strided_slice %157 {offsets = [0, 0], sizes = [8, 96], strides = [1, 1]} : vector<8x128xf32> to vector<8x96xf32>
    %159 = arith.negf %158 : vector<8x96xf32>
    %160 = math.exp %159 : vector<8x96xf32>
    %cst_37 = arith.constant 1.000000e+00 : f32
    %161 = vector.broadcast %cst_37 : f32 to vector<8x96xf32>
    %162 = arith.addf %161, %160 : vector<8x96xf32>
    %163 = arith.divf %161, %162 : vector<8x96xf32>
    %164 = vector.extract_strided_slice %163 {offsets = [0, 0], sizes = [8, 32], strides = [1, 1]} : vector<8x96xf32> to vector<8x32xf32>
    %165 = vector.extract_strided_slice %163 {offsets = [0, 32], sizes = [8, 32], strides = [1, 1]} : vector<8x96xf32> to vector<8x32xf32>
    %166 = vector.extract_strided_slice %163 {offsets = [0, 64], sizes = [8, 32], strides = [1, 1]} : vector<8x96xf32> to vector<8x32xf32>
    %167 = vector.extract_strided_slice %157 {offsets = [0, 96], sizes = [8, 32], strides = [1, 1]} : vector<8x128xf32> to vector<8x32xf32>
    %168 = math.tanh %167 : vector<8x32xf32>
    %169 = arith.mulf %165, %150 : vector<8x32xf32>
    %170 = arith.mulf %164, %168 : vector<8x32xf32>
    %171 = arith.addf %169, %170 : vector<8x32xf32>
    %172 = math.tanh %171 : vector<8x32xf32>
    %173 = arith.mulf %166, %172 : vector<8x32xf32>
    %c8_i32 = arith.constant 8 : i32
    %c0_38 = arith.constant 0 : index
    %c0_39 = arith.constant 0 : index
    %174 = vector.load %arg5[%c0_38, %c0_39] : memref<8x32xf32, #tpu.memory_space<vmem>>, vector<8x32xf32>
    tpu.vector_store %arg5[%c0_38, %c0_39], %173 {strides = array<i32>} : memref<8x32xf32, #tpu.memory_space<vmem>>, vector<8x32xf32>,
    %c0_40 = arith.constant 0 : index
    %c0_41 = arith.constant 0 : index
    %175 = vector.load %arg6[%c0_40, %c0_41] : memref<8x32xf32, #tpu.memory_space<vmem>>, vector<8x32xf32>
    tpu.vector_store %arg6[%c0_40, %c0_41], %171 {strides = array<i32>} : memref<8x32xf32, #tpu.memory_space<vmem>>, vector<8x32xf32>,
    %c0_i32_42 = arith.constant 0 : i32
    %176 = arith.cmpi eq, %arg1, %c0_i32_42 : i32
    %177 = arith.extui %176 : i1 to i32
    %c0_i32_43 = arith.constant 0 : i32
    %178 = arith.cmpi ne, %177, %c0_i32_43 : i32
    scf.if %178 {
      %c0_44 = arith.constant 0 : index
      %c0_45 = arith.constant 0 : index
      %179 = vector.load %arg4[%c0_44, %c0_45] : memref<8x32xf32, #tpu.memory_space<vmem>>, vector<8x32xf32>
      tpu.vector_store %arg4[%c0_44, %c0_45], %173 {strides = array<i32>} : memref<8x32xf32, #tpu.memory_space<vmem>>, vector<8x32xf32>,
    } else {
    }
    return
  }
  func.func @transform_0(%arg0: i32, %arg1: i32) -> (i32, i32, i32) {
    %c0_i32 = arith.constant 0 : i32
    %c0_i32_0 = arith.constant 0 : i32
    return %arg1, %arg0, %c0_i32 : i32, i32, i32
  }
  func.func @transform_1(%arg0: i32, %arg1: i32) -> (i32, i32) {
    %c0_i32 = arith.constant 0 : i32
    %c0_i32_0 = arith.constant 0 : i32
    %c0_i32_1 = arith.constant 0 : i32
    return %c0_i32, %c0_i32_0 : i32, i32
  }
  func.func @transform_2(%arg0: i32, %arg1: i32) -> (i32, i32) {
    %c0_i32 = arith.constant 0 : i32
    %c0_i32_0 = arith.constant 0 : i32
    return %arg0, %c0_i32 : i32, i32
  }
}

</mosaic_0001>

<bundles_post_ra>
// kernel: tpu_custom_call.1
= control target key start
LH: loop header
LB: loop body
LE: loop exit
PB: predicated region body
PF: predicated region fallthrough
CT: control target
= control target key end

     0   :  { %7 = vsyncpa [#allocation5], 0  ;;  %s1402_s0 = inlined_call_operand.hbm [shape: f32[8,8,128], index: 0, kind: input, shape index: {}]   ;;  %s1403_s1 = inlined_call_operand.hbm [shape: f32[32,128], index: 1, kind: input, shape index: {}]   ;;  %s1404_s2 = inlined_call_operand.hbm [shape: f32[8,32], index: 2, kind: output, shape index: {}]  }
   0x1   :  { %8 = vsyncpa [#allocation8], 0 }
   0x2   :  { %9 = vsyncpa [#allocation6], 0  ;;  %s1240_s9 = smov [#allocation4]   ;;  %s1168_s13 = scalar_lea.hbm %s1402_s0, 1024 }
   0x3   :  { %s15_s10 = sshll.u32 %s1240_s9, 4  ;;  %p1169_p0 = scmp.ne.s32.totalorder %s1402_s0, %s1168_s13  ;;  %s16_s10 = int_to_ptr.vmem [resolvable:$true] %s15_s10 }
   0x4   :  { %p1172_p1 = scmp.lt.u32.totalorder %s1168_s13, %s1402_s0 }
   0x6   :  { %p1174_p2 = pnand %p1172_p1, %p1169_p0 }
   0x8   :  { %1177 = shalt.err (!%p1174_p2)
}
   0x9   :  { %s1178_s18 = scalar_lea.vmem %s16_s10, 1024  ;;  %p1183_p4 = scmp.lt.s32.totalorder %s16_s10, %s16_s10 }
   0xa   :  { %p1179_p3 = scmp.ne.s32.totalorder %s16_s10, %s1178_s18  ;;  %p1184_p5 = scmp.lt.s32.totalorder %s1178_s18, %s1178_s18 }
   0xc   :  { %p1185_p6 = por %p1184_p5, %p1183_p4 }
   0xe   :  { %p1186_p7 = pnand %p1185_p6, %p1179_p3 }
  0x10   :  { %1189 = shalt.err (!%p1186_p7)
}
  0x11   :  { %s1241_s19 = smov 128   ;;  %s1242_s20 = smov 8  }
  0x12   :  { %21 = dma.hbm_to_vmem [thread:$0]  %s1402_s0, 1024, %s16_s10, [#allocation5], %s1241_s19, %s1241_s19, %s1242_s20  }
  0x13   :  { %s1243_s23 = smov [#allocation7]   ;;  %s1190_s27 = scalar_lea.hbm %s1403_s1, 512 }
  0x14   :  { %s27_s24 = sshll.u32 %s1243_s23, 4  ;;  %p1191_p8 = scmp.ne.s32.totalorder %s1403_s1, %s1190_s27  ;;  %s28_s24 = int_to_ptr.vmem [resolvable:$true] %s27_s24 }
  0x15   :  { %p1194_p9 = scmp.lt.u32.totalorder %s1190_s27, %s1403_s1 }
  0x17   :  { %p1196_p10 = pnand %p1194_p9, %p1191_p8 }
  0x19   :  { %1199 = shalt.err (!%p1196_p10)
}
  0x1a   :  { %s1200_s4 = scalar_lea.vmem %s28_s24, 512  ;;  %p1205_p12 = scmp.lt.s32.totalorder %s28_s24, %s28_s24 }
  0x1b   :  { %p1201_p11 = scmp.ne.s32.totalorder %s28_s24, %s1200_s4  ;;  %p1206_p13 = scmp.lt.s32.totalorder %s1200_s4, %s1200_s4 }
  0x1d   :  { %p1207_p0 = por %p1206_p13, %p1205_p12 }
  0x1f   :  { %p1208_p1 = pnand %p1207_p0, %p1201_p11 }
  0x21   :  { %1211 = shalt.err (!%p1208_p1)
}
  0x22   :  { %33 = dma.hbm_to_vmem [thread:$0]  %s1403_s1, 512, %s28_s24, [#allocation8], %s1241_s19, %s1241_s19, %s1242_s20  }
  0x23   :  { %1234 = dma.done.wait [#allocation5], 1024  }
  0x24   :  { %1235 = vsyncadd [#allocation5], 4294966272 }
  0x25   :  { %1236 = dma.done.wait [#allocation8], 512  }
  0x26   :  { %1237 = vsyncadd [#allocation8], 4294966784  ;;  %vm44_vm0 = vcmask 261120   ;;  %v1244_v0 = vmov 0.0|0.0   ;;  %vm1245_vm1 = vmmov 0   ;;  %v1246_v1 = vmov 0.0  }
  0x27   :  { %1045 = vmatprep.subr.bf16.mxu0 %v1244_v0  ;;  %965 = vmatprep.mubr.msk.f32.mxu0 %vm1245_vm1, %v1246_v1  ;;  %45 = vst.msk [vmem:[#allocation2] sm:$0xff] %vm44_vm0, %v1246_v1  ;;  %46 = vst.msk [vmem:[#allocation3] sm:$0xff] %vm44_vm0, %v1246_v1  ;;  %v47_v2 = vld [vmem:[#allocation7] sm:$0xff]  ;;  %v48_v3 = vld [vmem:[#allocation7 + $0x8] sm:$0xff]  ;;  %s1247_s1 = smov 32   ;;  %s1248_s6 = smov 64  }
  0x28   :  { %1051 = vmatprep.subr.bf16.mxu1 %v1244_v0  ;;  %976 = vmatprep.mubr.msk.f32.mxu1 %vm1245_vm1, %v1246_v1  ;;  %v49_v4 = vld [vmem:[#allocation7 + $0x10] sm:$0xff]  ;;  %v1300_v5 = vpack.c.bf16 %v48_v3, %v47_v2  ;;  %v50_v6 = vld [vmem:[#allocation7 + $0x18] sm:$0xff]  ;;  %v53_v9 = vld [vmem:[#allocation4] sm:$0xff]  ;;  %s1249_s7 = smov 96   ;;  %s1250_s8 = smov [#allocation9]  }
  0x29   :  { %v1303_v7 = vpack.c.bf16 %v50_v6, %v49_v4  ;;  %v158_v29 = vld [vmem:[#allocation4 + $0x8] sm:$0xff]  ;;  %v260_v47 = vld [vmem:[#allocation4 + $0x10] sm:$0xff]  ;;  %v362_v3 = vld [vmem:[#allocation4 + $0x18] sm:$0xff]  ;;  %s891_s9 = sshll.u32 %s1250_s8, 4  ;;  %s892_s9 = int_to_ptr.vmem [resolvable:$true] %s891_s9 }
  0x2a   :  { %1047 = vmatpush3.bf16.msra.mxu0 %v1300_v5  ;;  %1053 = vmatpush3.bf16.msra.mxu1 %v1300_v5  ;;  %s1212_s10 = scalar_lea.vmem %s892_s9, 128  ;;  %p1217_p3 = scmp.lt.s32.totalorder %s892_s9, %s892_s9 }
  0x2b   :  { %1048 = vmatprep.subr.bf16.mxu0 %v1244_v0  ;;  %1054 = vmatprep.subr.bf16.mxu1 %v1244_v0  ;;  %p1213_p2 = scmp.ne.s32.totalorder %s892_s9, %s1212_s10  ;;  %p1218_p4 = scmp.lt.s32.totalorder %s1212_s10, %s1212_s10 }
  0x2d   :  { %p1219_p5 = por %p1218_p4, %p1217_p3 }
  0x2e   :  { %1050 = vmatpush3.bf16.msra.mxu0 %v1303_v7  ;;  %v51_v8 = vld [vmem:[#allocation2] sm:$0xff]  ;;  %1056 = vmatpush3.bf16.msra.mxu1 %v1303_v7  ;;  %v52_v14 = vld [vmem:[#allocation3] sm:$0xff] }
  0x2f   :  { %1057 = vmatprep.subr.bf16.mxu0 %v1244_v0  ;;  %1063 = vmatprep.subr.bf16.mxu1 %v1244_v0  ;;  %p1220_p6 = pnand %p1219_p5, %p1213_p2 }
  0x31   :  { %966 = vmatmul.mubr.msk.f32.vlgmr.msra.gmra.mrb[0].mxu0 %vm44_vm0, %v51_v8 }
  0x32   :  { %1059 = vmatpush3.bf16.msra.mxu0 %v1300_v5  ;;  %987 = vmatprep.mubr.msk.f32.mxu0 %vm1245_vm1, %v1246_v1 }
  0x33   :  { %1060 = vmatprep.subr.bf16.mxu0 %v1244_v0 }
  0x36   :  { %1062 = vmatpush3.bf16.msra.mxu0 %v1303_v7 }
  0x37   :  { %1069 = vmatprep.subr.bf16.mxu0 %v1244_v0 }
 0x104   :  { %v124_v10 = vpop.f32.mrb[0].mxu0 }
 0x105   :  { %v128_v11 = vadd.f32 %v124_v10, %v53_v9  ;;  %v967_v12 = vpop.f32.mrb[1].mxu0 }
 0x107   :  { %1104 = vtanh.f32 %v128_v11  ;;  %v902_v15 = vmul.f32 -1.442695, %v128_v11 }
 0x109   :  { %1106 = vpow2.f32 %v902_v15 }
 0x111   :  { %v1105_v13 = vpop.eup %1104 }
 0x112   :  { %142 = vrot.lane.b32.xlu0 %v1105_v13, %s1247_s1 }
 0x113   :  { %v1107_v16 = vpop.eup %1106 }
 0x114   :  { %v132_v17 = vadd.f32 1.0, %v1107_v16 }
 0x116   :  { %137 = vrot.lane.b32.xlu0 %v52_v14, %s1247_s1  ;;  %1108 = vrcp.f32 %v132_v17 }
 0x120   :  { %v1109_v18 = vpop.eup %1108 }
 0x184   :  { %v143_v19 = vpop.permute.xlu0 %142 }
 0x185   :  { %v145_v20 = vmul.f32 %v1109_v18, %v143_v19 }
 0x187   :  { %147 = vrot.lane.b32.xlu1 %v145_v20, %s1247_s1 }
 0x188   :  { %v138_v21 = vpop.permute.xlu0 %137 }
 0x189   :  { %v140_v22 = vmul.f32 %v1109_v18, %v138_v21 }
 0x1f9   :  { %v148_v23 = vpop.permute.xlu1 %147 }
 0x1fa   :  { %v150_v24 = vadd.f32 %v148_v23, %v140_v22  ;;  %v464_v23 = vld [vmem:[#allocation4 + $0x20] sm:$0xff] }
 0x1fc   :  { %1110 = vtanh.f32 %v150_v24 }
 0x206   :  { %v1111_v25 = vpop.eup %1110 }
 0x207   :  { %153 = vrot.lane.b32.xlu1 %v1111_v25, %s1247_s1 }
 0x279   :  { %v154_v26 = vpop.permute.xlu1 %153 }
 0x27a   :  { %v156_v27 = vmul.f32 %v1109_v18, %v154_v26 }
 0x27c   :  { %160 = vrot.lane.b32.xlu0 %v156_v27, %s1248_s6 }
 0x2ee   :  { %v161_v28 = vpop.permute.xlu0 %160 }
 0x2ef   :  { %977 = vmatmul.mubr.msk.f32.vlgmr.msra.gmra.mrb[0].mxu1 %vm44_vm0, %v161_v28 }
 0x2f0   :  { %1065 = vmatpush3.bf16.msra.mxu1 %v1300_v5  ;;  %998 = vmatprep.mubr.msk.f32.mxu1 %vm1245_vm1, %v1246_v1 }
 0x2f1   :  { %1066 = vmatprep.subr.bf16.mxu1 %v1244_v0 }
 0x2f4   :  { %1068 = vmatpush3.bf16.msra.mxu1 %v1303_v7 }
 0x2f5   :  { %1075 = vmatprep.subr.bf16.mxu1 %v1244_v0 }
 0x3c2   :  { %v230_v30 = vpop.f32.mrb[0].mxu1 }
 0x3c3   :  { %v234_v31 = vadd.f32 %v230_v30, %v158_v29  ;;  %v978_v32 = vpop.f32.mrb[1].mxu1 }
 0x3c5   :  { %1112 = vtanh.f32 %v234_v31  ;;  %v904_v34 = vmul.f32 -1.442695, %v234_v31 }
 0x3c7   :  { %1114 = vpow2.f32 %v904_v34 }
 0x3cf   :  { %v1113_v33 = vpop.eup %1112 }
 0x3d0   :  { %244 = vrot.lane.b32.xlu1 %v1113_v33, %s1247_s1 }
 0x3d1   :  { %v1115_v35 = vpop.eup %1114 }
 0x3d2   :  { %v238_v36 = vadd.f32 1.0, %v1115_v35 }
 0x3d4   :  { %1116 = vrcp.f32 %v238_v36 }
 0x3de   :  { %v1117_v37 = vpop.eup %1116 }
 0x3df   :  { %v242_v40 = vmul.f32 %v1117_v37, %v150_v24 }
 0x442   :  { %v245_v38 = vpop.permute.xlu1 %244 }
 0x443   :  { %v247_v39 = vmul.f32 %v1117_v37, %v245_v38 }
 0x445   :  { %249 = vrot.lane.b32.xlu0 %v247_v39, %s1247_s1 }
 0x4b7   :  { %v250_v41 = vpop.permute.xlu0 %249 }
 0x4b8   :  { %v252_v42 = vadd.f32 %v250_v41, %v242_v40  ;;  %v566_v41 = vld [vmem:[#allocation4 + $0x28] sm:$0xff] }
 0x4ba   :  { %1118 = vtanh.f32 %v252_v42 }
 0x4c4   :  { %v1119_v43 = vpop.eup %1118 }
 0x4c5   :  { %255 = vrot.lane.b32.xlu1 %v1119_v43, %s1247_s1 }
 0x537   :  { %v256_v44 = vpop.permute.xlu1 %255 }
 0x538   :  { %v258_v45 = vmul.f32 %v1117_v37, %v256_v44 }
 0x53a   :  { %262 = vrot.lane.b32.xlu0 %v258_v45, %s1248_s6 }
 0x5ac   :  { %v263_v46 = vpop.permute.xlu0 %262 }
 0x5ad   :  { %988 = vmatmul.mubr.msk.f32.vlgmr.msra.gmra.mrb[2].mxu0 %vm44_vm0, %v263_v46 }
 0x5ae   :  { %1071 = vmatpush3.bf16.msra.mxu0 %v1300_v5  ;;  %1009 = vmatprep.mubr.msk.f32.mxu0 %vm1245_vm1, %v1246_v1 }
 0x5af   :  { %1072 = vmatprep.subr.bf16.mxu0 %v1244_v0 }
 0x5b2   :  { %1074 = vmatpush3.bf16.msra.mxu0 %v1303_v7 }
 0x5b3   :  { %1081 = vmatprep.subr.bf16.mxu0 %v1244_v0 }
 0x680   :  { %v332_v48 = vpop.f32.mrb[2].mxu0 }
 0x681   :  { %v336_v49 = vadd.f32 %v332_v48, %v260_v47  ;;  %v989_v50 = vpop.f32.mrb[3].mxu0 }
 0x683   :  { %1120 = vtanh.f32 %v336_v49  ;;  %v906_v52 = vmul.f32 -1.442695, %v336_v49 }
 0x685   :  { %1122 = vpow2.f32 %v906_v52 }
 0x68d   :  { %v1121_v51 = vpop.eup %1120 }
 0x68e   :  { %346 = vrot.lane.b32.xlu1 %v1121_v51, %s1247_s1 }
 0x68f   :  { %v1123_v53 = vpop.eup %1122 }
 0x690   :  { %v340_v54 = vadd.f32 1.0, %v1123_v53 }
 0x692   :  { %1124 = vrcp.f32 %v340_v54 }
 0x69c   :  { %v1125_v55 = vpop.eup %1124 }
 0x69d   :  { %v344_v58 = vmul.f32 %v1125_v55, %v252_v42 }
 0x700   :  { %v347_v56 = vpop.permute.xlu1 %346 }
 0x701   :  { %v349_v57 = vmul.f32 %v1125_v55, %v347_v56 }
 0x703   :  { %351 = vrot.lane.b32.xlu0 %v349_v57, %s1247_s1 }
 0x775   :  { %v352_v59 = vpop.permute.xlu0 %351 }
 0x776   :  { %v354_v60 = vadd.f32 %v352_v59, %v344_v58 }
 0x778   :  { %1126 = vtanh.f32 %v354_v60 }
 0x782   :  { %v1127_v61 = vpop.eup %1126 }
 0x783   :  { %357 = vrot.lane.b32.xlu1 %v1127_v61, %s1247_s1 }
 0x7f5   :  { %v358_v62 = vpop.permute.xlu1 %357 }
 0x7f6   :  { %v360_v63 = vmul.f32 %v1125_v55, %v358_v62  ;;  %v668_v55 = vld [vmem:[#allocation4 + $0x30] sm:$0xff] }
 0x7f8   :  { %364 = vrot.lane.b32.xlu0 %v360_v63, %s1248_s6 }
 0x86a   :  { %v365_v2 = vpop.permute.xlu0 %364 }
 0x86b   :  { %999 = vmatmul.mubr.msk.f32.vlgmr.msra.gmra.mrb[2].mxu1 %vm44_vm0, %v365_v2 }
 0x86c   :  { %1077 = vmatpush3.bf16.msra.mxu1 %v1300_v5  ;;  %1020 = vmatprep.mubr.msk.f32.mxu1 %vm1245_vm1, %v1246_v1 }
 0x86d   :  { %1078 = vmatprep.subr.bf16.mxu1 %v1244_v0 }
 0x870   :  { %1080 = vmatpush3.bf16.msra.mxu1 %v1303_v7 }
 0x871   :  { %1087 = vmatprep.subr.bf16.mxu1 %v1244_v0 }
 0x93e   :  { %v434_v4 = vpop.f32.mrb[2].mxu1 }
 0x93f   :  { %v438_v6 = vadd.f32 %v434_v4, %v362_v3  ;;  %v1000_v8 = vpop.f32.mrb[3].mxu1 }
 0x941   :  { %1128 = vtanh.f32 %v438_v6  ;;  %v908_v10 = vmul.f32 -1.442695, %v438_v6 }
 0x943   :  { %1130 = vpow2.f32 %v908_v10 }
 0x94b   :  { %v1129_v9 = vpop.eup %1128 }
 0x94c   :  { %448 = vrot.lane.b32.xlu1 %v1129_v9, %s1247_s1 }
 0x94d   :  { %v1131_v11 = vpop.eup %1130 }
 0x94e   :  { %v442_v12 = vadd.f32 1.0, %v1131_v11 }
 0x950   :  { %1132 = vrcp.f32 %v442_v12 }
 0x95a   :  { %v1133_v13 = vpop.eup %1132 }
 0x95b   :  { %v446_v16 = vmul.f32 %v1133_v13, %v354_v60 }
 0x9be   :  { %v449_v14 = vpop.permute.xlu1 %448 }
 0x9bf   :  { %v451_v15 = vmul.f32 %v1133_v13, %v449_v14 }
 0x9c1   :  { %453 = vrot.lane.b32.xlu0 %v451_v15, %s1247_s1 }
 0xa33   :  { %v454_v17 = vpop.permute.xlu0 %453 }
 0xa34   :  { %v456_v18 = vadd.f32 %v454_v17, %v446_v16 }
 0xa36   :  { %1134 = vtanh.f32 %v456_v18 }
 0xa40   :  { %v1135_v19 = vpop.eup %1134 }
 0xa41   :  { %459 = vrot.lane.b32.xlu1 %v1135_v19, %s1247_s1 }
 0xab3   :  { %v460_v20 = vpop.permute.xlu1 %459 }
 0xab4   :  { %v462_v21 = vmul.f32 %v1133_v13, %v460_v20  ;;  %v770_v13 = vld [vmem:[#allocation4 + $0x38] sm:$0xff] }
 0xab6   :  { %466 = vrot.lane.b32.xlu0 %v462_v21, %s1248_s6 }
 0xb28   :  { %v467_v22 = vpop.permute.xlu0 %466 }
 0xb29   :  { %1010 = vmatmul.mubr.msk.f32.vlgmr.msra.gmra.mrb[4].mxu0 %vm44_vm0, %v467_v22 }
 0xb2a   :  { %1083 = vmatpush3.bf16.msra.mxu0 %v1300_v5  ;;  %1031 = vmatprep.mubr.msk.f32.mxu0 %vm1245_vm1, %v1246_v1 }
 0xb2b   :  { %1084 = vmatprep.subr.bf16.mxu0 %v1244_v0 }
 0xb2e   :  { %1086 = vmatpush3.bf16.msra.mxu0 %v1303_v7 }
 0xbfc   :  { %v536_v24 = vpop.f32.mrb[4].mxu0 }
 0xbfd   :  { %v540_v25 = vadd.f32 %v536_v24, %v464_v23  ;;  %v1011_v26 = vpop.f32.mrb[5].mxu0 }
 0xbff   :  { %1136 = vtanh.f32 %v540_v25  ;;  %v910_v28 = vmul.f32 -1.442695, %v540_v25 }
 0xc01   :  { %1138 = vpow2.f32 %v910_v28 }
 0xc09   :  { %v1137_v27 = vpop.eup %1136 }
 0xc0a   :  { %550 = vrot.lane.b32.xlu1 %v1137_v27, %s1247_s1 }
 0xc0b   :  { %v1139_v29 = vpop.eup %1138 }
 0xc0c   :  { %v544_v30 = vadd.f32 1.0, %v1139_v29 }
 0xc0e   :  { %1140 = vrcp.f32 %v544_v30 }
 0xc18   :  { %v1141_v31 = vpop.eup %1140 }
 0xc19   :  { %v548_v34 = vmul.f32 %v1141_v31, %v456_v18 }
 0xc7c   :  { %v551_v32 = vpop.permute.xlu1 %550 }
 0xc7d   :  { %v553_v33 = vmul.f32 %v1141_v31, %v551_v32 }
 0xc7f   :  { %555 = vrot.lane.b32.xlu0 %v553_v33, %s1247_s1 }
 0xcf1   :  { %v556_v35 = vpop.permute.xlu0 %555 }
 0xcf2   :  { %v558_v36 = vadd.f32 %v556_v35, %v548_v34 }
 0xcf4   :  { %1142 = vtanh.f32 %v558_v36 }
 0xcfe   :  { %v1143_v37 = vpop.eup %1142 }
 0xcff   :  { %561 = vrot.lane.b32.xlu1 %v1143_v37, %s1247_s1 }
 0xd71   :  { %v562_v38 = vpop.permute.xlu1 %561 }
 0xd72   :  { %v564_v39 = vmul.f32 %v1141_v31, %v562_v38 }
 0xd74   :  { %568 = vrot.lane.b32.xlu0 %v564_v39, %s1248_s6 }
 0xde6   :  { %v569_v40 = vpop.permute.xlu0 %568 }
 0xde7   :  { %1021 = vmatmul.mubr.msk.f32.vlgmr.msra.gmra.mrb[4].mxu1 %vm44_vm0, %v569_v40 }
 0xde8   :  { %1089 = vmatpush3.bf16.msra.mxu1 %v1300_v5  ;;  %1042 = vmatprep.mubr.msk.f32.mxu1 %vm1245_vm1, %v1246_v1 }
 0xde9   :  { %1090 = vmatprep.subr.bf16.mxu1 %v1244_v0 }
 0xdec   :  { %1092 = vmatpush3.bf16.msra.mxu1 %v1303_v7 }
 0xeba   :  { %v638_v42 = vpop.f32.mrb[4].mxu1 }
 0xebb   :  { %v642_v43 = vadd.f32 %v638_v42, %v566_v41  ;;  %v1022_v44 = vpop.f32.mrb[5].mxu1 }
 0xebd   :  { %1144 = vtanh.f32 %v642_v43  ;;  %v912_v46 = vmul.f32 -1.442695, %v642_v43 }
 0xebf   :  { %1146 = vpow2.f32 %v912_v46 }
 0xec7   :  { %v1145_v45 = vpop.eup %1144 }
 0xec8   :  { %652 = vrot.lane.b32.xlu1 %v1145_v45, %s1247_s1 }
 0xec9   :  { %v1147_v47 = vpop.eup %1146 }
 0xeca   :  { %v646_v48 = vadd.f32 1.0, %v1147_v47 }
 0xecc   :  { %1148 = vrcp.f32 %v646_v48 }
 0xed6   :  { %v1149_v5 = vpop.eup %1148 }
 0xed7   :  { %v650_v0 = vmul.f32 %v1149_v5, %v558_v36 }
 0xf3a   :  { %v653_v49 = vpop.permute.xlu1 %652 }
 0xf3b   :  { %v655_v1 = vmul.f32 %v1149_v5, %v653_v49 }
 0xf3d   :  { %657 = vrot.lane.b32.xlu0 %v655_v1, %s1247_s1 }
 0xfaf   :  { %v658_v7 = vpop.permute.xlu0 %657 }
 0xfb0   :  { %v660_v50 = vadd.f32 %v658_v7, %v650_v0 }
 0xfb2   :  { %1150 = vtanh.f32 %v660_v50 }
 0xfbc   :  { %v1151_v51 = vpop.eup %1150 }
 0xfbd   :  { %663 = vrot.lane.b32.xlu1 %v1151_v51, %s1247_s1 }
0x102f   :  { %v664_v52 = vpop.permute.xlu1 %663 }
0x1030   :  { %v666_v53 = vmul.f32 %v1149_v5, %v664_v52 }
0x1032   :  { %670 = vrot.lane.b32.xlu0 %v666_v53, %s1248_s6 }
0x10a4   :  { %v671_v54 = vpop.permute.xlu0 %670 }
0x10a5   :  { %1032 = vmatmul.mubr.msk.f32.vlgmr.msra.gmra.mrb[6].mxu0 %vm44_vm0, %v671_v54 }
0x1178   :  { %v740_v56 = vpop.f32.mrb[6].mxu0 }
0x1179   :  { %v744_v57 = vadd.f32 %v740_v56, %v668_v55  ;;  %v1033_v58 = vpop.f32.mrb[7].mxu0 }
0x117b   :  { %1152 = vtanh.f32 %v744_v57  ;;  %v914_v60 = vmul.f32 -1.442695, %v744_v57 }
0x117d   :  { %1154 = vpow2.f32 %v914_v60 }
0x1185   :  { %v1153_v59 = vpop.eup %1152 }
0x1186   :  { %754 = vrot.lane.b32.xlu1 %v1153_v59, %s1247_s1 }
0x1187   :  { %v1155_v61 = vpop.eup %1154 }
0x1188   :  { %v748_v62 = vadd.f32 1.0, %v1155_v61 }
0x118a   :  { %1156 = vrcp.f32 %v748_v62 }
0x1194   :  { %v1157_v63 = vpop.eup %1156 }
0x1195   :  { %v752_v4 = vmul.f32 %v1157_v63, %v660_v50 }
0x11f8   :  { %v755_v2 = vpop.permute.xlu1 %754 }
0x11f9   :  { %v757_v3 = vmul.f32 %v1157_v63, %v755_v2 }
0x11fb   :  { %759 = vrot.lane.b32.xlu0 %v757_v3, %s1247_s1 }
0x126d   :  { %v760_v6 = vpop.permute.xlu0 %759 }
0x126e   :  { %v762_v8 = vadd.f32 %v760_v6, %v752_v4 }
0x1270   :  { %1158 = vtanh.f32 %v762_v8 }
0x127a   :  { %v1159_v9 = vpop.eup %1158 }
0x127b   :  { %765 = vrot.lane.b32.xlu1 %v1159_v9, %s1247_s1 }
0x12ed   :  { %v766_v10 = vpop.permute.xlu1 %765 }
0x12ee   :  { %v768_v11 = vmul.f32 %v1157_v63, %v766_v10 }
0x12f0   :  { %772 = vrot.lane.b32.xlu0 %v768_v11, %s1248_s6 }
0x1362   :  { %v773_v12 = vpop.permute.xlu0 %772 }
0x1363   :  { %1043 = vmatmul.mubr.msk.f32.vlgmr.msra.gmra.mrb[6].mxu1 %vm44_vm0, %v773_v12 }
0x1436   :  { %v842_v14 = vpop.f32.mrb[6].mxu1 }
0x1437   :  { %v846_v15 = vadd.f32 %v842_v14, %v770_v13  ;;  %v1044_v16 = vpop.f32.mrb[7].mxu1 }
0x1439   :  { %1160 = vtanh.f32 %v846_v15  ;;  %v916_v18 = vmul.f32 -1.442695, %v846_v15 }
0x143b   :  { %1162 = vpow2.f32 %v916_v18 }
0x1443   :  { %v1161_v17 = vpop.eup %1160 }
0x1444   :  { %856 = vrot.lane.b32.xlu1 %v1161_v17, %s1247_s1 }
0x1445   :  { %v1163_v19 = vpop.eup %1162 }
0x1446   :  { %v850_v20 = vadd.f32 1.0, %v1163_v19 }
0x1448   :  { %1164 = vrcp.f32 %v850_v20 }
0x1452   :  { %v1165_v21 = vpop.eup %1164 }
0x1453   :  { %v854_v24 = vmul.f32 %v1165_v21, %v762_v8 }
0x14b6   :  { %v857_v22 = vpop.permute.xlu1 %856 }
0x14b7   :  { %v859_v23 = vmul.f32 %v1165_v21, %v857_v22 }
0x14b9   :  { %861 = vrot.lane.b32.xlu0 %v859_v23, %s1247_s1 }
0x152b   :  { %v862_v25 = vpop.permute.xlu0 %861 }
0x152c   :  { %v864_v26 = vadd.f32 %v862_v25, %v854_v24 }
0x152e   :  { %1166 = vtanh.f32 %v864_v26 }
0x1538   :  { %v1167_v27 = vpop.eup %1166 }
0x1539   :  { %867 = vrot.lane.b32.xlu1 %v1167_v27, %s1247_s1 }
0x153d   :  { %877 = vrot.lane.b32.xlu1 %v864_v26, %s1249_s7 }
0x15ab   :  { %v868_v28 = vpop.permute.xlu1 %867 }
0x15ac   :  { %v870_v29 = vmul.f32 %v1165_v21, %v868_v28 }
0x15ae   :  { %872 = vrot.lane.b32.xlu0 %v870_v29, %s1248_s6 }
0x15af   :  { %v878_v30 = vpop.permute.xlu1 %877 }
0x15b0   :  { %880 = vst.msk [vmem:[#allocation3] sm:$0xff] %vm44_vm0, %v878_v30 }
0x1620   :  { %v873_v31 = vpop.permute.xlu0 %872 }
0x1621   :  { %875 = vst.msk [vmem:[#allocation2] sm:$0xff] %vm44_vm0, %v873_v31  ;;  %884 = vst.msk [vmem:[#allocation9] sm:$0xff] %vm44_vm0, %v873_v31 }
0x1622   :  { %1223 = shalt.err (!%p1220_p6)
}
0x1623   :  { %s1224_s13 = scalar_lea.hbm %s1404_s2, 128 }
0x1624   :  { %p1225_p7 = scmp.ne.s32.totalorder %s1404_s2, %s1224_s13  ;;  %p1228_p8 = scmp.lt.u32.totalorder %s1224_s13, %s1404_s2 }
0x1626   :  { %p1230_p9 = pnand %p1228_p8, %p1225_p7 }
0x1628   :  { %1233 = shalt.err (!%p1230_p9)
}
0x1629   :  { %894 = dma.vmem_to_hbm [thread:$0]  %s892_s9, 128, %s1404_s2, [#allocation6]  }
0x162a   :  { %1238 = dma.done.wait [#allocation6], 128  }
0x162b   :  { %1239 = vsyncadd [#allocation6], 4294967168 }
0x162c   :  { %898 = vsyncpa [#allocation5], 1 }
0x162d   :  { %899 = vsyncpa [#allocation8], 1 }
0x162e   :  { %900 = vsyncpa [#allocation6], 1 }

// kernel: tpu_custom_call.1
= control target key start
LH: loop header
LB: loop body
LE: loop exit
PB: predicated region body
PF: predicated region fallthrough
CT: control target
= control target key end

     0   :  { %7 = vsyncpa [#allocation5], 0  ;;  %s1402_s0 = inlined_call_operand.hbm [shape: f32[8,8,128], index: 0, kind: input, shape index: {}]   ;;  %s1403_s1 = inlined_call_operand.hbm [shape: f32[32,128], index: 1, kind: input, shape index: {}]   ;;  %s1404_s2 = inlined_call_operand.hbm [shape: f32[8,32], index: 2, kind: output, shape index: {}]  }
   0x1   :  { %8 = vsyncpa [#allocation8], 0 }
   0x2   :  { %9 = vsyncpa [#allocation6], 0  ;;  %s1240_s9 = smov [#allocation4]   ;;  %s1168_s13 = scalar_lea.hbm %s1402_s0, 1024 }
   0x3   :  { %s15_s10 = sshll.u32 %s1240_s9, 4  ;;  %p1169_p0 = scmp.ne.s32.totalorder %s1402_s0, %s1168_s13  ;;  %s16_s10 = int_to_ptr.vmem [resolvable:$true] %s15_s10 }
   0x4   :  { %p1172_p1 = scmp.lt.u32.totalorder %s1168_s13, %s1402_s0 }
   0x6   :  { %p1174_p2 = pnand %p1172_p1, %p1169_p0 }
   0x8   :  { %1177 = shalt.err (!%p1174_p2)
}
   0x9   :  { %s1178_s18 = scalar_lea.vmem %s16_s10, 1024  ;;  %p1183_p4 = scmp.lt.s32.totalorder %s16_s10, %s16_s10 }
   0xa   :  { %p1179_p3 = scmp.ne.s32.totalorder %s16_s10, %s1178_s18  ;;  %p1184_p5 = scmp.lt.s32.totalorder %s1178_s18, %s1178_s18 }
   0xc   :  { %p1185_p6 = por %p1184_p5, %p1183_p4 }
   0xe   :  { %p1186_p7 = pnand %p1185_p6, %p1179_p3 }
  0x10   :  { %1189 = shalt.err (!%p1186_p7)
}
  0x11   :  { %s1241_s19 = smov 128   ;;  %s1242_s20 = smov 8  }
  0x12   :  { %21 = dma.hbm_to_vmem [thread:$0]  %s1402_s0, 1024, %s16_s10, [#allocation5], %s1241_s19, %s1241_s19, %s1242_s20  }
  0x13   :  { %s1243_s23 = smov [#allocation7]   ;;  %s1190_s27 = scalar_lea.hbm %s1403_s1, 512 }
  0x14   :  { %s27_s24 = sshll.u32 %s1243_s23, 4  ;;  %p1191_p8 = scmp.ne.s32.totalorder %s1403_s1, %s1190_s27  ;;  %s28_s24 = int_to_ptr.vmem [resolvable:$true] %s27_s24 }
  0x15   :  { %p1194_p9 = scmp.lt.u32.totalorder %s1190_s27, %s1403_s1 }
  0x17   :  { %p1196_p10 = pnand %p1194_p9, %p1191_p8 }
  0x19   :  { %1199 = shalt.err (!%p1196_p10)
}
  0x1a   :  { %s1200_s4 = scalar_lea.vmem %s28_s24, 512  ;;  %p1205_p12 = scmp.lt.s32.totalorder %s28_s24, %s28_s24 }
  0x1b   :  { %p1201_p11 = scmp.ne.s32.totalorder %s28_s24, %s1200_s4  ;;  %p1206_p13 = scmp.lt.s32.totalorder %s1200_s4, %s1200_s4 }
  0x1d   :  { %p1207_p0 = por %p1206_p13, %p1205_p12 }
  0x1f   :  { %p1208_p1 = pnand %p1207_p0, %p1201_p11 }
  0x21   :  { %1211 = shalt.err (!%p1208_p1)
}
  0x22   :  { %33 = dma.hbm_to_vmem [thread:$0]  %s1403_s1, 512, %s28_s24, [#allocation8], %s1241_s19, %s1241_s19, %s1242_s20  }
  0x23   :  { %1234 = dma.done.wait [#allocation5], 1024  }
  0x24   :  { %1235 = vsyncadd [#allocation5], 4294966272 }
  0x25   :  { %1236 = dma.done.wait [#allocation8], 512  }
  0x26   :  { %1237 = vsyncadd [#allocation8], 4294966784  ;;  %vm44_vm0 = vcmask 261120   ;;  %v1244_v0 = vmov 0.0|0.0   ;;  %vm1245_vm1 = vmmov 0   ;;  %v1246_v1 = vmov 0.0  }
  0x27   :  { %1045 = vmatprep.subr.bf16.mxu0 %v1244_v0  ;;  %965 = vmatprep.mubr.msk.f32.mxu0 %vm1245_vm1, %v1246_v1  ;;  %45 = vst.msk [vmem:[#allocation2] sm:$0xff] %vm44_vm0, %v1246_v1  ;;  %46 = vst.msk [vmem:[#allocation3] sm:$0xff] %vm44_vm0, %v1246_v1  ;;  %v47_v2 = vld [vmem:[#allocation7] sm:$0xff]  ;;  %v48_v3 = vld [vmem:[#allocation7 + $0x8] sm:$0xff]  ;;  %s1247_s1 = smov 32   ;;  %s1248_s6 = smov 64  }
  0x28   :  { %1051 = vmatprep.subr.bf16.mxu1 %v1244_v0  ;;  %976 = vmatprep.mubr.msk.f32.mxu1 %vm1245_vm1, %v1246_v1  ;;  %v49_v4 = vld [vmem:[#allocation7 + $0x10] sm:$0xff]  ;;  %v1300_v5 = vpack.c.bf16 %v48_v3, %v47_v2  ;;  %v50_v6 = vld [vmem:[#allocation7 + $0x18] sm:$0xff]  ;;  %v53_v9 = vld [vmem:[#allocation4] sm:$0xff]  ;;  %s1249_s7 = smov 96   ;;  %s1250_s8 = smov [#allocation9]  }
  0x29   :  { %v1303_v7 = vpack.c.bf16 %v50_v6, %v49_v4  ;;  %v158_v29 = vld [vmem:[#allocation4 + $0x8] sm:$0xff]  ;;  %v260_v47 = vld [vmem:[#allocation4 + $0x10] sm:$0xff]  ;;  %v362_v3 = vld [vmem:[#allocation4 + $0x18] sm:$0xff]  ;;  %s891_s9 = sshll.u32 %s1250_s8, 4  ;;  %s892_s9 = int_to_ptr.vmem [resolvable:$true] %s891_s9 }
  0x2a   :  { %1047 = vmatpush3.bf16.msra.mxu0 %v1300_v5  ;;  %1053 = vmatpush3.bf16.msra.mxu1 %v1300_v5  ;;  %s1212_s10 = scalar_lea.vmem %s892_s9, 128  ;;  %p1217_p3 = scmp.lt.s32.totalorder %s892_s9, %s892_s9 }
  0x2b   :  { %1048 = vmatprep.subr.bf16.mxu0 %v1244_v0  ;;  %1054 = vmatprep.subr.bf16.mxu1 %v1244_v0  ;;  %p1213_p2 = scmp.ne.s32.totalorder %s892_s9, %s1212_s10  ;;  %p1218_p4 = scmp.lt.s32.totalorder %s1212_s10, %s1212_s10 }
  0x2d   :  { %p1219_p5 = por %p1218_p4, %p1217_p3 }
  0x2e   :  { %1050 = vmatpush3.bf16.msra.mxu0 %v1303_v7  ;;  %v51_v8 = vld [vmem:[#allocation2] sm:$0xff]  ;;  %1056 = vmatpush3.bf16.msra.mxu1 %v1303_v7  ;;  %v52_v14 = vld [vmem:[#allocation3] sm:$0xff] }
  0x2f   :  { %1057 = vmatprep.subr.bf16.mxu0 %v1244_v0  ;;  %1063 = vmatprep.subr.bf16.mxu1 %v1244_v0  ;;  %p1220_p6 = pnand %p1219_p5, %p1213_p2 }
  0x31   :  { %966 = vmatmul.mubr.msk.f32.vlgmr.msra.gmra.mrb[0].mxu0 %vm44_vm0, %v51_v8 }
  0x32   :  { %1059 = vmatpush3.bf16.msra.mxu0 %v1300_v5  ;;  %987 = vmatprep.mubr.msk.f32.mxu0 %vm1245_vm1, %v1246_v1 }
  0x33   :  { %1060 = vmatprep.subr.bf16.mxu0 %v1244_v0 }
  0x36   :  { %1062 = vmatpush3.bf16.msra.mxu0 %v1303_v7 }
  0x37   :  { %1069 = vmatprep.subr.bf16.mxu0 %v1244_v0 }
 0x104   :  { %v124_v10 = vpop.f32.mrb[0].mxu0 }
 0x105   :  { %v128_v11 = vadd.f32 %v124_v10, %v53_v9  ;;  %v967_v12 = vpop.f32.mrb[1].mxu0 }
 0x107   :  { %1104 = vtanh.f32 %v128_v11  ;;  %v902_v15 = vmul.f32 -1.442695, %v128_v11 }
 0x109   :  { %1106 = vpow2.f32 %v902_v15 }
 0x111   :  { %v1105_v13 = vpop.eup %1104 }
 0x112   :  { %142 = vrot.lane.b32.xlu0 %v1105_v13, %s1247_s1 }
 0x113   :  { %v1107_v16 = vpop.eup %1106 }
 0x114   :  { %v132_v17 = vadd.f32 1.0, %v1107_v16 }
 0x116   :  { %137 = vrot.lane.b32.xlu0 %v52_v14, %s1247_s1  ;;  %1108 = vrcp.f32 %v132_v17 }
 0x120   :  { %v1109_v18 = vpop.eup %1108 }
 0x184   :  { %v143_v19 = vpop.permute.xlu0 %142 }
 0x185   :  { %v145_v20 = vmul.f32 %v1109_v18, %v143_v19 }
 0x187   :  { %147 = vrot.lane.b32.xlu1 %v145_v20, %s1247_s1 }
 0x188   :  { %v138_v21 = vpop.permute.xlu0 %137 }
 0x189   :  { %v140_v22 = vmul.f32 %v1109_v18, %v138_v21 }
 0x1f9   :  { %v148_v23 = vpop.permute.xlu1 %147 }
 0x1fa   :  { %v150_v24 = vadd.f32 %v148_v23, %v140_v22  ;;  %v464_v23 = vld [vmem:[#allocation4 + $0x20] sm:$0xff] }
 0x1fc   :  { %1110 = vtanh.f32 %v150_v24 }
 0x206   :  { %v1111_v25 = vpop.eup %1110 }
 0x207   :  { %153 = vrot.lane.b32.xlu1 %v1111_v25, %s1247_s1 }
 0x279   :  { %v154_v26 = vpop.permute.xlu1 %153 }
 0x27a   :  { %v156_v27 = vmul.f32 %v1109_v18, %v154_v26 }
 0x27c   :  { %160 = vrot.lane.b32.xlu0 %v156_v27, %s1248_s6 }
 0x2ee   :  { %v161_v28 = vpop.permute.xlu0 %160 }
 0x2ef   :  { %977 = vmatmul.mubr.msk.f32.vlgmr.msra.gmra.mrb[0].mxu1 %vm44_vm0, %v161_v28 }
 0x2f0   :  { %1065 = vmatpush3.bf16.msra.mxu1 %v1300_v5  ;;  %998 = vmatprep.mubr.msk.f32.mxu1 %vm1245_vm1, %v1246_v1 }
 0x2f1   :  { %1066 = vmatprep.subr.bf16.mxu1 %v1244_v0 }
 0x2f4   :  { %1068 = vmatpush3.bf16.msra.mxu1 %v1303_v7 }
 0x2f5   :  { %1075 = vmatprep.subr.bf16.mxu1 %v1244_v0 }
 0x3c2   :  { %v230_v30 = vpop.f32.mrb[0].mxu1 }
 0x3c3   :  { %v234_v31 = vadd.f32 %v230_v30, %v158_v29  ;;  %v978_v32 = vpop.f32.mrb[1].mxu1 }
 0x3c5   :  { %1112 = vtanh.f32 %v234_v31  ;;  %v904_v34 = vmul.f32 -1.442695, %v234_v31 }
 0x3c7   :  { %1114 = vpow2.f32 %v904_v34 }
 0x3cf   :  { %v1113_v33 = vpop.eup %1112 }
 0x3d0   :  { %244 = vrot.lane.b32.xlu1 %v1113_v33, %s1247_s1 }
 0x3d1   :  { %v1115_v35 = vpop.eup %1114 }
 0x3d2   :  { %v238_v36 = vadd.f32 1.0, %v1115_v35 }
 0x3d4   :  { %1116 = vrcp.f32 %v238_v36 }
 0x3de   :  { %v1117_v37 = vpop.eup %1116 }
 0x3df   :  { %v242_v40 = vmul.f32 %v1117_v37, %v150_v24 }
 0x442   :  { %v245_v38 = vpop.permute.xlu1 %244 }
 0x443   :  { %v247_v39 = vmul.f32 %v1117_v37, %v245_v38 }
 0x445   :  { %249 = vrot.lane.b32.xlu0 %v247_v39, %s1247_s1 }
 0x4b7   :  { %v250_v41 = vpop.permute.xlu0 %249 }
 0x4b8   :  { %v252_v42 = vadd.f32 %v250_v41, %v242_v40  ;;  %v566_v41 = vld [vmem:[#allocation4 + $0x28] sm:$0xff] }
 0x4ba   :  { %1118 = vtanh.f32 %v252_v42 }
 0x4c4   :  { %v1119_v43 = vpop.eup %1118 }
 0x4c5   :  { %255 = vrot.lane.b32.xlu1 %v1119_v43, %s1247_s1 }
 0x537   :  { %v256_v44 = vpop.permute.xlu1 %255 }
 0x538   :  { %v258_v45 = vmul.f32 %v1117_v37, %v256_v44 }
 0x53a   :  { %262 = vrot.lane.b32.xlu0 %v258_v45, %s1248_s6 }
 0x5ac   :  { %v263_v46 = vpop.permute.xlu0 %262 }
 0x5ad   :  { %988 = vmatmul.mubr.msk.f32.vlgmr.msra.gmra.mrb[2].mxu0 %vm44_vm0, %v263_v46 }
 0x5ae   :  { %1071 = vmatpush3.bf16.msra.mxu0 %v1300_v5  ;;  %1009 = vmatprep.mubr.msk.f32.mxu0 %vm1245_vm1, %v1246_v1 }
 0x5af   :  { %1072 = vmatprep.subr.bf16.mxu0 %v1244_v0 }
 0x5b2   :  { %1074 = vmatpush3.bf16.msra.mxu0 %v1303_v7 }
 0x5b3   :  { %1081 = vmatprep.subr.bf16.mxu0 %v1244_v0 }
 0x680   :  { %v332_v48 = vpop.f32.mrb[2].mxu0 }
 0x681   :  { %v336_v49 = vadd.f32 %v332_v48, %v260_v47  ;;  %v989_v50 = vpop.f32.mrb[3].mxu0 }
 0x683   :  { %1120 = vtanh.f32 %v336_v49  ;;  %v906_v52 = vmul.f32 -1.442695, %v336_v49 }
 0x685   :  { %1122 = vpow2.f32 %v906_v52 }
 0x68d   :  { %v1121_v51 = vpop.eup %1120 }
 0x68e   :  { %346 = vrot.lane.b32.xlu1 %v1121_v51, %s1247_s1 }
 0x68f   :  { %v1123_v53 = vpop.eup %1122 }
 0x690   :  { %v340_v54 = vadd.f32 1.0, %v1123_v53 }
 0x692   :  { %1124 = vrcp.f32 %v340_v54 }
 0x69c   :  { %v1125_v55 = vpop.eup %1124 }
 0x69d   :  { %v344_v58 = vmul.f32 %v1125_v55, %v252_v42 }
 0x700   :  { %v347_v56 = vpop.permute.xlu1 %346 }
 0x701   :  { %v349_v57 = vmul.f32 %v1125_v55, %v347_v56 }
 0x703   :  { %351 = vrot.lane.b32.xlu0 %v349_v57, %s1247_s1 }
 0x775   :  { %v352_v59 = vpop.permute.xlu0 %351 }
 0x776   :  { %v354_v60 = vadd.f32 %v352_v59, %v344_v58 }
 0x778   :  { %1126 = vtanh.f32 %v354_v60 }
 0x782   :  { %v1127_v61 = vpop.eup %1126 }
 0x783   :  { %357 = vrot.lane.b32.xlu1 %v1127_v61, %s1247_s1 }
 0x7f5   :  { %v358_v62 = vpop.permute.xlu1 %357 }
 0x7f6   :  { %v360_v63 = vmul.f32 %v1125_v55, %v358_v62  ;;  %v668_v55 = vld [vmem:[#allocation4 + $0x30] sm:$0xff] }
 0x7f8   :  { %364 = vrot.lane.b32.xlu0 %v360_v63, %s1248_s6 }
 0x86a   :  { %v365_v2 = vpop.permute.xlu0 %364 }
 0x86b   :  { %999 = vmatmul.mubr.msk.f32.vlgmr.msra.gmra.mrb[2].mxu1 %vm44_vm0, %v365_v2 }
 0x86c   :  { %1077 = vmatpush3.bf16.msra.mxu1 %v1300_v5  ;;  %1020 = vmatprep.mubr.msk.f32.mxu1 %vm1245_vm1, %v1246_v1 }
 0x86d   :  { %1078 = vmatprep.subr.bf16.mxu1 %v1244_v0 }
 0x870   :  { %1080 = vmatpush3.bf16.msra.mxu1 %v1303_v7 }
 0x871   :  { %1087 = vmatprep.subr.bf16.mxu1 %v1244_v0 }
 0x93e   :  { %v434_v4 = vpop.f32.mrb[2].mxu1 }
 0x93f   :  { %v438_v6 = vadd.f32 %v434_v4, %v362_v3  ;;  %v1000_v8 = vpop.f32.mrb[3].mxu1 }
 0x941   :  { %1128 = vtanh.f32 %v438_v6  ;;  %v908_v10 = vmul.f32 -1.442695, %v438_v6 }
 0x943   :  { %1130 = vpow2.f32 %v908_v10 }
 0x94b   :  { %v1129_v9 = vpop.eup %1128 }
 0x94c   :  { %448 = vrot.lane.b32.xlu1 %v1129_v9, %s1247_s1 }
 0x94d   :  { %v1131_v11 = vpop.eup %1130 }
 0x94e   :  { %v442_v12 = vadd.f32 1.0, %v1131_v11 }
 0x950   :  { %1132 = vrcp.f32 %v442_v12 }
 0x95a   :  { %v1133_v13 = vpop.eup %1132 }
 0x95b   :  { %v446_v16 = vmul.f32 %v1133_v13, %v354_v60 }
 0x9be   :  { %v449_v14 = vpop.permute.xlu1 %448 }
 0x9bf   :  { %v451_v15 = vmul.f32 %v1133_v13, %v449_v14 }
 0x9c1   :  { %453 = vrot.lane.b32.xlu0 %v451_v15, %s1247_s1 }
 0xa33   :  { %v454_v17 = vpop.permute.xlu0 %453 }
 0xa34   :  { %v456_v18 = vadd.f32 %v454_v17, %v446_v16 }
 0xa36   :  { %1134 = vtanh.f32 %v456_v18 }
 0xa40   :  { %v1135_v19 = vpop.eup %1134 }
 0xa41   :  { %459 = vrot.lane.b32.xlu1 %v1135_v19, %s1247_s1 }
 0xab3   :  { %v460_v20 = vpop.permute.xlu1 %459 }
 0xab4   :  { %v462_v21 = vmul.f32 %v1133_v13, %v460_v20  ;;  %v770_v13 = vld [vmem:[#allocation4 + $0x38] sm:$0xff] }
 0xab6   :  { %466 = vrot.lane.b32.xlu0 %v462_v21, %s1248_s6 }
 0xb28   :  { %v467_v22 = vpop.permute.xlu0 %466 }
 0xb29   :  { %1010 = vmatmul.mubr.msk.f32.vlgmr.msra.gmra.mrb[4].mxu0 %vm44_vm0, %v467_v22 }
 0xb2a   :  { %1083 = vmatpush3.bf16.msra.mxu0 %v1300_v5  ;;  %1031 = vmatprep.mubr.msk.f32.mxu0 %vm1245_vm1, %v1246_v1 }
 0xb2b   :  { %1084 = vmatprep.subr.bf16.mxu0 %v1244_v0 }
 0xb2e   :  { %1086 = vmatpush3.bf16.msra.mxu0 %v1303_v7 }
 0xbfc   :  { %v536_v24 = vpop.f32.mrb[4].mxu0 }
 0xbfd   :  { %v540_v25 = vadd.f32 %v536_v24, %v464_v23  ;;  %v1011_v26 = vpop.f32.mrb[5].mxu0 }
 0xbff   :  { %1136 = vtanh.f32 %v540_v25  ;;  %v910_v28 = vmul.f32 -1.442695, %v540_v25 }
 0xc01   :  { %1138 = vpow2.f32 %v910_v28 }
 0xc09   :  { %v1137_v27 = vpop.eup %1136 }
 0xc0a   :  { %550 = vrot.lane.b32.xlu1 %v1137_v27, %s1247_s1 }
 0xc0b   :  { %v1139_v29 = vpop.eup %1138 }
 0xc0c   :  { %v544_v30 = vadd.f32 1.0, %v1139_v29 }
 0xc0e   :  { %1140 = vrcp.f32 %v544_v30 }
 0xc18   :  { %v1141_v31 = vpop.eup %1140 }
 0xc19   :  { %v548_v34 = vmul.f32 %v1141_v31, %v456_v18 }
 0xc7c   :  { %v551_v32 = vpop.permute.xlu1 %550 }
 0xc7d   :  { %v553_v33 = vmul.f32 %v1141_v31, %v551_v32 }
 0xc7f   :  { %555 = vrot.lane.b32.xlu0 %v553_v33, %s1247_s1 }
 0xcf1   :  { %v556_v35 = vpop.permute.xlu0 %555 }
 0xcf2   :  { %v558_v36 = vadd.f32 %v556_v35, %v548_v34 }
 0xcf4   :  { %1142 = vtanh.f32 %v558_v36 }
 0xcfe   :  { %v1143_v37 = vpop.eup %1142 }
 0xcff   :  { %561 = vrot.lane.b32.xlu1 %v1143_v37, %s1247_s1 }
 0xd71   :  { %v562_v38 = vpop.permute.xlu1 %561 }
 0xd72   :  { %v564_v39 = vmul.f32 %v1141_v31, %v562_v38 }
 0xd74   :  { %568 = vrot.lane.b32.xlu0 %v564_v39, %s1248_s6 }
 0xde6   :  { %v569_v40 = vpop.permute.xlu0 %568 }
 0xde7   :  { %1021 = vmatmul.mubr.msk.f32.vlgmr.msra.gmra.mrb[4].mxu1 %vm44_vm0, %v569_v40 }
 0xde8   :  { %1089 = vmatpush3.bf16.msra.mxu1 %v1300_v5  ;;  %1042 = vmatprep.mubr.msk.f32.mxu1 %vm1245_vm1, %v1246_v1 }
 0xde9   :  { %1090 = vmatprep.subr.bf16.mxu1 %v1244_v0 }
 0xdec   :  { %1092 = vmatpush3.bf16.msra.mxu1 %v1303_v7 }
 0xeba   :  { %v638_v42 = vpop.f32.mrb[4].mxu1 }
 0xebb   :  { %v642_v43 = vadd.f32 %v638_v42, %v566_v41  ;;  %v1022_v44 = vpop.f32.mrb[5].mxu1 }
 0xebd   :  { %1144 = vtanh.f32 %v642_v43  ;;  %v912_v46 = vmul.f32 -1.442695, %v642_v43 }
 0xebf   :  { %1146 = vpow2.f32 %v912_v46 }
 0xec7   :  { %v1145_v45 = vpop.eup %1144 }
 0xec8   :  { %652 = vrot.lane.b32.xlu1 %v1145_v45, %s1247_s1 }
 0xec9   :  { %v1147_v47 = vpop.eup %1146 }
 0xeca   :  { %v646_v48 = vadd.f32 1.0, %v1147_v47 }
 0xecc   :  { %1148 = vrcp.f32 %v646_v48 }
 0xed6   :  { %v1149_v5 = vpop.eup %1148 }
 0xed7   :  { %v650_v0 = vmul.f32 %v1149_v5, %v558_v36 }
 0xf3a   :  { %v653_v49 = vpop.permute.xlu1 %652 }
 0xf3b   :  { %v655_v1 = vmul.f32 %v1149_v5, %v653_v49 }
 0xf3d   :  { %657 = vrot.lane.b32.xlu0 %v655_v1, %s1247_s1 }
 0xfaf   :  { %v658_v7 = vpop.permute.xlu0 %657 }
 0xfb0   :  { %v660_v50 = vadd.f32 %v658_v7, %v650_v0 }
 0xfb2   :  { %1150 = vtanh.f32 %v660_v50 }
 0xfbc   :  { %v1151_v51 = vpop.eup %1150 }
 0xfbd   :  { %663 = vrot.lane.b32.xlu1 %v1151_v51, %s1247_s1 }
0x102f   :  { %v664_v52 = vpop.permute.xlu1 %663 }
0x1030   :  { %v666_v53 = vmul.f32 %v1149_v5, %v664_v52 }
0x1032   :  { %670 = vrot.lane.b32.xlu0 %v666_v53, %s1248_s6 }
0x10a4   :  { %v671_v54 = vpop.permute.xlu0 %670 }
0x10a5   :  { %1032 = vmatmul.mubr.msk.f32.vlgmr.msra.gmra.mrb[6].mxu0 %vm44_vm0, %v671_v54 }
0x1178   :  { %v740_v56 = vpop.f32.mrb[6].mxu0 }
0x1179   :  { %v744_v57 = vadd.f32 %v740_v56, %v668_v55  ;;  %v1033_v58 = vpop.f32.mrb[7].mxu0 }
0x117b   :  { %1152 = vtanh.f32 %v744_v57  ;;  %v914_v60 = vmul.f32 -1.442695, %v744_v57 }
0x117d   :  { %1154 = vpow2.f32 %v914_v60 }
0x1185   :  { %v1153_v59 = vpop.eup %1152 }
0x1186   :  { %754 = vrot.lane.b32.xlu1 %v1153_v59, %s1247_s1 }
0x1187   :  { %v1155_v61 = vpop.eup %1154 }
0x1188   :  { %v748_v62 = vadd.f32 1.0, %v1155_v61 }
0x118a   :  { %1156 = vrcp.f32 %v748_v62 }
0x1194   :  { %v1157_v63 = vpop.eup %1156 }
0x1195   :  { %v752_v4 = vmul.f32 %v1157_v63, %v660_v50 }
0x11f8   :  { %v755_v2 = vpop.permute.xlu1 %754 }
0x11f9   :  { %v757_v3 = vmul.f32 %v1157_v63, %v755_v2 }
0x11fb   :  { %759 = vrot.lane.b32.xlu0 %v757_v3, %s1247_s1 }
0x126d   :  { %v760_v6 = vpop.permute.xlu0 %759 }
0x126e   :  { %v762_v8 = vadd.f32 %v760_v6, %v752_v4 }
0x1270   :  { %1158 = vtanh.f32 %v762_v8 }
0x127a   :  { %v1159_v9 = vpop.eup %1158 }
0x127b   :  { %765 = vrot.lane.b32.xlu1 %v1159_v9, %s1247_s1 }
0x12ed   :  { %v766_v10 = vpop.permute.xlu1 %765 }
0x12ee   :  { %v768_v11 = vmul.f32 %v1157_v63, %v766_v10 }
0x12f0   :  { %772 = vrot.lane.b32.xlu0 %v768_v11, %s1248_s6 }
0x1362   :  { %v773_v12 = vpop.permute.xlu0 %772 }
0x1363   :  { %1043 = vmatmul.mubr.msk.f32.vlgmr.msra.gmra.mrb[6].mxu1 %vm44_vm0, %v773_v12 }
0x1436   :  { %v842_v14 = vpop.f32.mrb[6].mxu1 }
0x1437   :  { %v846_v15 = vadd.f32 %v842_v14, %v770_v13  ;;  %v1044_v16 = vpop.f32.mrb[7].mxu1 }
0x1439   :  { %1160 = vtanh.f32 %v846_v15  ;;  %v916_v18 = vmul.f32 -1.442695, %v846_v15 }
0x143b   :  { %1162 = vpow2.f32 %v916_v18 }
0x1443   :  { %v1161_v17 = vpop.eup %1160 }
0x1444   :  { %856 = vrot.lane.b32.xlu1 %v1161_v17, %s1247_s1 }
0x1445   :  { %v1163_v19 = vpop.eup %1162 }
0x1446   :  { %v850_v20 = vadd.f32 1.0, %v1163_v19 }
0x1448   :  { %1164 = vrcp.f32 %v850_v20 }
0x1452   :  { %v1165_v21 = vpop.eup %1164 }
0x1453   :  { %v854_v24 = vmul.f32 %v1165_v21, %v762_v8 }
0x14b6   :  { %v857_v22 = vpop.permute.xlu1 %856 }
0x14b7   :  { %v859_v23 = vmul.f32 %v1165_v21, %v857_v22 }
0x14b9   :  { %861 = vrot.lane.b32.xlu0 %v859_v23, %s1247_s1 }
0x152b   :  { %v862_v25 = vpop.permute.xlu0 %861 }
0x152c   :  { %v864_v26 = vadd.f32 %v862_v25, %v854_v24 }
0x152e   :  { %1166 = vtanh.f32 %v864_v26 }
0x1538   :  { %v1167_v27 = vpop.eup %1166 }
0x1539   :  { %867 = vrot.lane.b32.xlu1 %v1167_v27, %s1247_s1 }
0x153d   :  { %877 = vrot.lane.b32.xlu1 %v864_v26, %s1249_s7 }
0x15ab   :  { %v868_v28 = vpop.permute.xlu1 %867 }
0x15ac   :  { %v870_v29 = vmul.f32 %v1165_v21, %v868_v28 }
0x15ae   :  { %872 = vrot.lane.b32.xlu0 %v870_v29, %s1248_s6 }
0x15af   :  { %v878_v30 = vpop.permute.xlu1 %877 }
0x15b0   :  { %880 = vst.msk [vmem:[#allocation3] sm:$0xff] %vm44_vm0, %v878_v30 }
0x1620   :  { %v873_v31 = vpop.permute.xlu0 %872 }
0x1621   :  { %875 = vst.msk [vmem:[#allocation2] sm:$0xff] %vm44_vm0, %v873_v31  ;;  %884 = vst.msk [vmem:[#allocation9] sm:$0xff] %vm44_vm0, %v873_v31 }
0x1622   :  { %1223 = shalt.err (!%p1220_p6)
}
0x1623   :  { %s1224_s13 = scalar_lea.hbm %s1404_s2, 128 }
0x1624   :  { %p1225_p7 = scmp.ne.s32.totalorder %s1404_s2, %s1224_s13  ;;  %p1228_p8 = scmp.lt.u32.totalorder %s1224_s13, %s1404_s2 }
0x1626   :  { %p1230_p9 = pnand %p1228_p8, %p1225_p7 }
0x1628   :  { %1233 = shalt.err (!%p1230_p9)
}
0x1629   :  { %894 = dma.vmem_to_hbm [thread:$0]  %s892_s9, 128, %s1404_s2, [#allocation6]  }
0x162a   :  { %1238 = dma.done.wait [#allocation6], 128  }
0x162b   :  { %1239 = vsyncadd [#allocation6], 4294967168 }
0x162c   :  { %898 = vsyncpa [#allocation5], 1 }
0x162d   :  { %899 = vsyncpa [#allocation8], 1 }
0x162e   :  { %900 = vsyncpa [#allocation6], 1 }

</bundles_post_ra>
